<compile_context>
chip_gen: v7x
topology: tpu7x:2x2x1
jax: 0.10.0
libtpu: 0.0.40
codegen_flags: <defaults>
</compile_context>

<pallas_src>
import math
import functools

import jax
import jax.numpy as jnp
from jax import lax
from jax.experimental import pallas as pl
from jax.experimental.pallas import tpu as pltpu

_MASK_VALUE = -1e30  # large finite negative (avoids inf-inf); exp underflows to 0.


def _vmem_limit_bytes():
    """90% of physical VMEM if queryable (128 MiB v5e/v6e, 64 MiB v7x), else 64 MiB."""
    try:
        return int(pltpu.get_tpu_info().vmem_capacity_bytes * 0.9)
    except Exception:
        return 64 * 1024 * 1024


def _for_each_head(n_head, body, max_unrolled):
    """Statically unroll small head counts; lax.fori_loop for GPT-scale head counts
    (bounds live ranges so online-softmax temporaries don't spill past 64 vregs)."""
    if n_head <= max_unrolled:
        for h in range(n_head):
            body(h)
    else:
        def _loop_body(h, carry):
            body(h)
            return carry
        lax.fori_loop(0, n_head, _loop_body, 0)


def _qkv_proj_kernel(x_ref, w_ref, b_ref, q_ref, k_ref, v_ref):
    """QKV projection: ONE wide (tq, C) x (C, 3C) MXU matmul per (batch, q-tile).
    Head-major q/k/v are written from lane slices of the wide result (free when
    hd % 128 == 0).  The 1/sqrt(hd) scale is pre-folded into the Q columns."""
    x = x_ref[0]                                   # (tq, C), compute dtype
    qkv = jnp.dot(x, w_ref[...], preferred_element_type=jnp.float32) + b_ref[...]
    n_head = q_ref.shape[1]
    hd = q_ref.shape[-1]
    C = n_head * hd
    for h in range(n_head):                        # cheap slice+store copies
        lo = h * hd
        q_ref[0, h] = qkv[:, lo:lo + hd].astype(q_ref.dtype)
        k_ref[0, h] = qkv[:, C + lo:C + lo + hd].astype(k_ref.dtype)
        v_ref[0, h] = qkv[:, 2 * C + lo:2 * C + lo + hd].astype(v_ref.dtype)


def _flash_attn_proj_kernel(q_ref, k_ref, v_ref, wp_ref, bp_ref, o_ref,
                            m_sc, l_sc, acc_sc, ohat_sc, *, max_unrolled_heads):
    """Flash-style causal attention (online softmax over kv tiles) fused with the
    output projection.  grid = (B, num_q_tiles, num_kv_tiles), kv innermost."""
    n_head = q_ref.shape[1]
    tq = q_ref.shape[2]
    tk = k_ref.shape[2]
    hd = q_ref.shape[-1]
    q_idx = pl.program_id(1)
    kv_idx = pl.program_id(2)

    @pl.when(kv_idx == 0)
    def _init():
        m_sc[...] = jnp.full_like(m_sc, _MASK_VALUE)
        l_sc[...] = jnp.zeros_like(l_sc)
        acc_sc[...] = jnp.zeros_like(acc_sc)

    def _attn_step(masked):
        if masked:
            # Built once per (diagonal) grid step, shared across heads.
            row = lax.broadcasted_iota(jnp.int32, (tq, tk), 0)
            col = lax.broadcasted_iota(jnp.int32, (tq, tk), 1)
            keep = col <= row

        def head_body(h):
            qh = q_ref[0, h]                       # (tq, hd)
            kh = k_ref[0, h]                       # (tk, hd)
            vh = v_ref[0, h]                       # (tk, hd)
            # Contract feature axes directly -- no materialized k transpose.
            # Q is pre-scaled by 1/sqrt(hd), so no per-step score multiply.
            s = lax.dot_general(qh, kh, (((1,), (1,)), ((), ())),
                                preferred_element_type=jnp.float32)  # (tq, tk) f32
            if masked:
                s = jnp.where(keep, s, _MASK_VALUE)
            m_prev = m_sc[h]                                          # (tq, 1)
            m_new = jnp.maximum(m_prev, jnp.max(s, axis=-1, keepdims=True))
            alpha = jnp.exp(m_prev - m_new)                           # (tq, 1)
            p = jnp.exp(s - m_new)                                    # (tq, tk) f32
            l_sc[h] = alpha * l_sc[h] + jnp.sum(p, axis=-1, keepdims=True)
            acc_sc[h] = alpha * acc_sc[h] + jnp.dot(
                p.astype(vh.dtype), vh, preferred_element_type=jnp.float32)
            m_sc[h] = m_new

        _for_each_head(n_head, head_body, max_unrolled_heads)

    # Strictly sub-diagonal tiles: fully valid -> unmasked path (no VPU selects).
    @pl.when(kv_idx < q_idx)
    def _off_diag():
        _attn_step(masked=False)

    # Diagonal tile: apply the causal mask (tq == tk, so only this tile masks).
    @pl.when(kv_idx == q_idx)
    def _diag():
        _attn_step(masked=True)

    # Strictly upper-triangular kv tiles are skipped entirely; their k/v index_map
    # is clamped to the diagonal block so no DMA was issued for them either.

    @pl.when(kv_idx == pl.num_programs(2) - 1)
    def _finalize():
        # Normalize each head once (flash-style), pack heads lane-dense into
        # (tq, C), then ONE full-depth (tq, C) x (C, C) output-projection GEMM.
        for h in range(n_head):
            # Exact reciprocal: runs once per q tile, keeps the 1e-4 tolerance.
            inv_l = pl.reciprocal(l_sc[h], approx=False)              # (tq, 1)
            ohat_sc[:, h * hd:(h + 1) * hd] = (acc_sc[h] * inv_l).astype(ohat_sc.dtype)
        o_ref[0] = (jnp.dot(ohat_sc[...], wp_ref[...],
                            preferred_element_type=jnp.float32)
                    + bp_ref[...]).astype(o_ref.dtype)


def causal_self_attention(x, w_attn, b_attn, w_proj, b_proj, *, n_head,
                          q_tile=256, kv_tile=256, compute_dtype=None,
                          max_unrolled_heads=4):
    """Forward pass of CausalSelfAttention (eval mode).

    x:      (B, T, C)
    w_attn: (C, 3C)   c_attn weight, stored (in, out)
    b_attn: (1, 3C)
    w_proj: (C, C)    c_proj weight, stored (in, out)
    b_proj: (1, C)
    compute_dtype: dtype of the MXU operands (activations / weights).  Use
        jnp.bfloat16 on all TPU generations (v5e/v6e/v7x) -- full-rate MXU and
        half the HBM/VMEM traffic.  Softmax statistics and accumulators stay f32.
    """
    B, T, C = x.shape
    H = n_head
    assert C % H == 0
    hd = C // H
    if compute_dtype is None:
        compute_dtype = x.dtype

    tq = min(q_tile, T)
    tk = min(kv_tile, T)
    assert T % tq == 0 and T % tk == 0, "seq_len must be divisible by the tile size"
    assert tq == tk, "diagonal-tile masking assumes square score tiles"

    # --- Host-side parameter prep (one-time) ---
    scale = 1.0 / math.sqrt(hd)
    # Fold 1/sqrt(hd) into the Q projection (weights + bias): removes the per-step
    # VPU multiply on every (tq, tk) score tile.
    w_attn_f = jnp.asarray(w_attn, jnp.float32).at[:, :C].multiply(scale)   # (C, 3C)
    b_attn_f = jnp.asarray(b_attn, jnp.float32).at[:, :C].multiply(scale)   # (1, 3C)

    w_attn_c = w_attn_f.astype(compute_dtype)                 # (C, 3C) MXU operand
    wp_c = jnp.asarray(w_proj).astype(compute_dtype)          # (C, C)  MXU operand
    bp_f = jnp.asarray(b_proj, jnp.float32).reshape(1, C)     # f32, added post-accum

    x_c = x.astype(compute_dtype)
    vmem_limit = _vmem_limit_bytes()

    # ---------------- Kernel A: tiled QKV projection ----------------
    qkv_struct = jax.ShapeDtypeStruct((B, H, T, hd), compute_dtype)
    q, k, v = pl.pallas_call(
        _qkv_proj_kernel,
        out_shape=(qkv_struct, qkv_struct, qkv_struct),
        grid_spec=pltpu.PrefetchScalarGridSpec(
            num_scalar_prefetch=0,
            grid=(B, T // tq),
            in_specs=[
                pl.BlockSpec((1, tq, C), lambda b, i: (b, i, 0)),
                pl.BlockSpec((C, 3 * C), lambda b, i: (0, 0)),   # resident weight
                pl.BlockSpec((1, 3 * C), lambda b, i: (0, 0)),   # resident bias (f32)
            ],
            out_specs=(
                pl.BlockSpec((1, H, tq, hd), lambda b, i: (b, 0, i, 0)),
                pl.BlockSpec((1, H, tq, hd), lambda b, i: (b, 0, i, 0)),
                pl.BlockSpec((1, H, tq, hd), lambda b, i: (b, 0, i, 0)),
            ),
        ),
        compiler_params=pltpu.CompilerParams(
            dimension_semantics=("parallel", "parallel"),
            vmem_limit_bytes=vmem_limit),
    )(x_c, w_attn_c, b_attn_f)

    # -------- Kernel B: flash attention + fused output projection --------
    kernel = functools.partial(_flash_attn_proj_kernel,
                               max_unrolled_heads=max_unrolled_heads)

    def kv_index_map(b, qi, ki):
        # Clamp to the diagonal: kv tiles strictly above it (compute-skipped via
        # pl.when in the kernel) reuse the previously fetched block -> no new DMA.
        return (b, 0, jnp.minimum(ki, qi), 0)

    out = pl.pallas_call(
        kernel,
        out_shape=jax.ShapeDtypeStruct((B, T, C), x.dtype),
        grid_spec=pltpu.PrefetchScalarGridSpec(
            num_scalar_prefetch=0,
            grid=(B, T // tq, T // tk),
            in_specs=[
                pl.BlockSpec((1, H, tq, hd), lambda b, qi, ki: (b, 0, qi, 0)),
                pl.BlockSpec((1, H, tk, hd), kv_index_map),
                pl.BlockSpec((1, H, tk, hd), kv_index_map),
                # Resident weights / bias (constant index_map -> fetched once).
                pl.BlockSpec((C, C), lambda b, qi, ki: (0, 0)),
                pl.BlockSpec((1, C), lambda b, qi, ki: (0, 0)),
            ],
            out_specs=pl.BlockSpec((1, tq, C), lambda b, qi, ki: (b, qi, 0)),
            scratch_shapes=[
                pltpu.VMEM((H, tq, 1), jnp.float32),    # running max  m
                pltpu.VMEM((H, tq, 1), jnp.float32),    # running sum  l
                pltpu.VMEM((H, tq, hd), jnp.float32),   # running output acc (per head)
                pltpu.VMEM((tq, C), compute_dtype),     # lane-dense packed heads
            ],
        ),
        compiler_params=pltpu.CompilerParams(
            dimension_semantics=("parallel", "parallel", "arbitrary"),
            vmem_limit_bytes=vmem_limit),
    )(q, k, v, wp_c, bp_f)
    return out


def _reference(x, w_attn, b_attn, w_proj, b_proj, n_head):
    B, T, C = x.shape
    hd = C // n_head
    qkv = jnp.einsum('btc,cd->btd', x, w_attn) + b_attn[0]
    q, k, v = jnp.split(qkv, 3, axis=-1)

    def heads(t):  # (B, T, C) -> (B, H, T, hd)
        return t.reshape(B, T, n_head, hd).transpose(0, 2, 1, 3)

    q, k, v = heads(q), heads(k), heads(v)
    att = jnp.einsum('bhqd,bhkd->bhqk', q, k) / math.sqrt(hd)
    mask = jnp.tril(jnp.ones((T, T), dtype=bool))
    att = jnp.where(mask[None, None], att, -jnp.inf)
    att = jax.nn.softmax(att, axis=-1)
    y = jnp.einsum('bhqk,bhkd->bhqd', att, v)
    y = y.transpose(0, 2, 1, 3).reshape(B, T, C)
    return jnp.einsum('btc,cd->btd', y, w_proj) + b_proj[0]


if __name__ == "__main__":
    # Small but lane-aligned shapes consistent with CausalSelfAttention:
    # d_model=256, n_head=2 (head_dim=128), seq_len=512, batch=2
    # -> default 256 tiles give grid (2, 2, 2): exercises causal block skipping,
    #    the clamped (no-DMA) kv index_map, and the online-softmax kv loop.
    d_model, seq_len, n_head = 256, 512, 2
    B = 2

    key = jax.random.PRNGKey(0)
    kx, k1, k2, k3, k4 = jax.random.split(key, 5)

    x = jax.random.normal(kx, (B, seq_len, d_model), dtype=jnp.float32)

    # nn.Linear(d_model, 3*d_model): weight (3C, C), bias (3C,).  Stored transposed.
    w_attn = jax.random.normal(k1, (d_model, 3 * d_model), dtype=jnp.float32) * 0.02
    b_attn = jax.random.normal(k2, (1, 3 * d_model), dtype=jnp.float32) * 0.02
    # nn.Linear(d_model, d_model)
    w_proj = jax.random.normal(k3, (d_model, d_model), dtype=jnp.float32) * 0.02
    b_proj = jax.random.normal(k4, (1, d_model), dtype=jnp.float32) * 0.02

    y_ref = _reference(x, w_attn, b_attn, w_proj, b_proj, n_head)

    # f32 path, default 256 tiles -> grid (2, 2, 2).
    y = causal_self_attention(x, w_attn, b_attn, w_proj, b_proj, n_head=n_head)
    y = jax.block_until_ready(y)
    assert y.shape == (B, seq_len, d_model)
    assert jnp.allclose(y, y_ref, atol=1e-4, rtol=1e-4), "f32 mismatch vs reference"

    # bf16 MXU-operand fast path (recommended on v5e/v6e/v7x), 128 tiles -> grid (2,4,4).
    y_bf16 = causal_self_attention(x, w_attn, b_attn, w_proj, b_proj,
                                   n_head=n_head, q_tile=128, kv_tile=128,
                                   compute_dtype=jnp.bfloat16)
    y_bf16 = jax.block_until_ready(y_bf16)
    assert jnp.allclose(y_bf16.astype(jnp.float32), y_ref, atol=3e-2, rtol=3e-2), \
        "bf16 mismatch vs reference"

    # Exercise the lax.fori_loop head-loop path (used for GPT-scale head counts).
    y_fori = causal_self_attention(x, w_attn, b_attn, w_proj, b_proj,
                                   n_head=n_head, max_unrolled_heads=0)
    y_fori = jax.block_until_ready(y_fori)
    assert jnp.allclose(y_fori, y_ref, atol=1e-4, rtol=1e-4), \
        "fori-loop head-path mismatch vs reference"

    print("KERNEL_OK")
</pallas_src>

<mosaic_0001>
module attributes {stable_mosaic.version = 11 : i64} {
  func.func @_qkv_proj_kernel(%arg0: i32, %arg1: i32, %arg2: memref<1x256x256xf32, #tpu.memory_space<vmem>>, %arg3: memref<256x768xf32, #tpu.memory_space<vmem>>, %arg4: memref<1x768xf32, #tpu.memory_space<vmem>>, %arg5: memref<1x2x256x128xf32, #tpu.memory_space<vmem>>, %arg6: memref<1x2x256x128xf32, #tpu.memory_space<vmem>>, %arg7: memref<1x2x256x128xf32, #tpu.memory_space<vmem>>) attributes {dimension_semantics = [#tpu.dimension_semantics<parallel>, #tpu.dimension_semantics<parallel>], iteration_bounds = array<i64: 2, 2>, scalar_prefetch = 0 : i64, scratch_operands = 0 : i64, tpu.core_type = #tpu.core_type<tc>, window_params = [{transform_indices = @transform_0, window_bounds = array<i64: 1, 256, 256>}, {pipeline_mode = #tpu.pipeline_mode<synchronous>, transform_indices = @transform_1, window_bounds = array<i64: 256, 768>}, {pipeline_mode = #tpu.pipeline_mode<synchronous>, transform_indices = @transform_2, window_bounds = array<i64: 1, 768>}, {transform_indices = @transform_3, window_bounds = array<i64: 1, 2, 256, 128>}, {transform_indices = @transform_4, window_bounds = array<i64: 1, 2, 256, 128>}, {transform_indices = @transform_5, window_bounds = array<i64: 1, 2, 256, 128>}]} {
    %c0 = arith.constant 0 : index
    %c0_0 = arith.constant 0 : index
    %c0_1 = arith.constant 0 : index
    %0 = vector.load %arg2[%c0, %c0_0, %c0_1] : memref<1x256x256xf32, #tpu.memory_space<vmem>>, vector<1x256x256xf32>
    %1 = vector.shape_cast %0 : vector<1x256x256xf32> to vector<256x256xf32>
    %c0_2 = arith.constant 0 : index
    %c0_3 = arith.constant 0 : index
    %2 = vector.load %arg3[%c0_2, %c0_3] : memref<256x768xf32, #tpu.memory_space<vmem>>, vector<256x768xf32>
    %cst = arith.constant dense<0.000000e+00> : vector<256x768xf32>
    %3 = tpu.matmul %1, %2, %cst {dimension_numbers = #tpu.dot_dimension_numbers<[1], [0], [0], [1], [0, 0, 1, 1], [], []>} : vector<256x256xf32>, vector<256x768xf32>, vector<256x768xf32> -> vector<256x768xf32>
    %c0_4 = arith.constant 0 : index
    %c0_5 = arith.constant 0 : index
    %4 = vector.load %arg4[%c0_4, %c0_5] : memref<1x768xf32, #tpu.memory_space<vmem>>, vector<1x768xf32>
    %5 = vector.broadcast %4 : vector<1x768xf32> to vector<256x768xf32>
    %6 = arith.addf %3, %5 : vector<256x768xf32>
    %7 = vector.extract_strided_slice %6 {offsets = [0, 0], sizes = [256, 128], strides = [1, 1]} : vector<256x768xf32> to vector<256x128xf32>
    %c0_6 = arith.constant 0 : index
    %c0_7 = arith.constant 0 : index
    %c0_8 = arith.constant 0 : index
    %c0_9 = arith.constant 0 : index
    %8 = vector.load %arg5[%c0_6, %c0_7, %c0_8, %c0_9] : memref<1x2x256x128xf32, #tpu.memory_space<vmem>>, vector<1x1x256x128xf32>
    %9 = vector.shape_cast %8 : vector<1x1x256x128xf32> to vector<256x128xf32>
    %10 = vector.shape_cast %7 : vector<256x128xf32> to vector<1x1x256x128xf32>
    tpu.vector_store %arg5[%c0_6, %c0_7, %c0_8, %c0_9], %10 {strides = array<i32>} : memref<1x2x256x128xf32, #tpu.memory_space<vmem>>, vector<1x1x256x128xf32>,
    %11 = vector.extract_strided_slice %6 {offsets = [0, 256], sizes = [256, 128], strides = [1, 1]} : vector<256x768xf32> to vector<256x128xf32>
    %c0_10 = arith.constant 0 : index
    %c0_11 = arith.constant 0 : index
    %c0_12 = arith.constant 0 : index
    %c0_13 = arith.constant 0 : index
    %12 = vector.load %arg6[%c0_10, %c0_11, %c0_12, %c0_13] : memref<1x2x256x128xf32, #tpu.memory_space<vmem>>, vector<1x1x256x128xf32>
    %13 = vector.shape_cast %12 : vector<1x1x256x128xf32> to vector<256x128xf32>
    %14 = vector.shape_cast %11 : vector<256x128xf32> to vector<1x1x256x128xf32>
    tpu.vector_store %arg6[%c0_10, %c0_11, %c0_12, %c0_13], %14 {strides = array<i32>} : memref<1x2x256x128xf32, #tpu.memory_space<vmem>>, vector<1x1x256x128xf32>,
    %15 = vector.extract_strided_slice %6 {offsets = [0, 512], sizes = [256, 128], strides = [1, 1]} : vector<256x768xf32> to vector<256x128xf32>
    %c0_14 = arith.constant 0 : index
    %c0_15 = arith.constant 0 : index
    %c0_16 = arith.constant 0 : index
    %c0_17 = arith.constant 0 : index
    %16 = vector.load %arg7[%c0_14, %c0_15, %c0_16, %c0_17] : memref<1x2x256x128xf32, #tpu.memory_space<vmem>>, vector<1x1x256x128xf32>
    %17 = vector.shape_cast %16 : vector<1x1x256x128xf32> to vector<256x128xf32>
    %18 = vector.shape_cast %15 : vector<256x128xf32> to vector<1x1x256x128xf32>
    tpu.vector_store %arg7[%c0_14, %c0_15, %c0_16, %c0_17], %18 {strides = array<i32>} : memref<1x2x256x128xf32, #tpu.memory_space<vmem>>, vector<1x1x256x128xf32>,
    %19 = vector.extract_strided_slice %6 {offsets = [0, 128], sizes = [256, 128], strides = [1, 1]} : vector<256x768xf32> to vector<256x128xf32>
    %c0_18 = arith.constant 0 : index
    %c1 = arith.constant 1 : index
    %c0_19 = arith.constant 0 : index
    %c0_20 = arith.constant 0 : index
    %20 = vector.load %arg5[%c0_18, %c1, %c0_19, %c0_20] : memref<1x2x256x128xf32, #tpu.memory_space<vmem>>, vector<1x1x256x128xf32>
    %21 = vector.shape_cast %20 : vector<1x1x256x128xf32> to vector<256x128xf32>
    %22 = vector.shape_cast %19 : vector<256x128xf32> to vector<1x1x256x128xf32>
    tpu.vector_store %arg5[%c0_18, %c1, %c0_19, %c0_20], %22 {strides = array<i32>} : memref<1x2x256x128xf32, #tpu.memory_space<vmem>>, vector<1x1x256x128xf32>,
    %23 = vector.extract_strided_slice %6 {offsets = [0, 384], sizes = [256, 128], strides = [1, 1]} : vector<256x768xf32> to vector<256x128xf32>
    %c0_21 = arith.constant 0 : index
    %c1_22 = arith.constant 1 : index
    %c0_23 = arith.constant 0 : index
    %c0_24 = arith.constant 0 : index
    %24 = vector.load %arg6[%c0_21, %c1_22, %c0_23, %c0_24] : memref<1x2x256x128xf32, #tpu.memory_space<vmem>>, vector<1x1x256x128xf32>
    %25 = vector.shape_cast %24 : vector<1x1x256x128xf32> to vector<256x128xf32>
    %26 = vector.shape_cast %23 : vector<256x128xf32> to vector<1x1x256x128xf32>
    tpu.vector_store %arg6[%c0_21, %c1_22, %c0_23, %c0_24], %26 {strides = array<i32>} : memref<1x2x256x128xf32, #tpu.memory_space<vmem>>, vector<1x1x256x128xf32>,
    %27 = vector.extract_strided_slice %6 {offsets = [0, 640], sizes = [256, 128], strides = [1, 1]} : vector<256x768xf32> to vector<256x128xf32>
    %c0_25 = arith.constant 0 : index
    %c1_26 = arith.constant 1 : index
    %c0_27 = arith.constant 0 : index
    %c0_28 = arith.constant 0 : index
    %28 = vector.load %arg7[%c0_25, %c1_26, %c0_27, %c0_28] : memref<1x2x256x128xf32, #tpu.memory_space<vmem>>, vector<1x1x256x128xf32>
    %29 = vector.shape_cast %28 : vector<1x1x256x128xf32> to vector<256x128xf32>
    %30 = vector.shape_cast %27 : vector<256x128xf32> to vector<1x1x256x128xf32>
    tpu.vector_store %arg7[%c0_25, %c1_26, %c0_27, %c0_28], %30 {strides = array<i32>} : memref<1x2x256x128xf32, #tpu.memory_space<vmem>>, vector<1x1x256x128xf32>,
    return
  }
  func.func @transform_0(%arg0: i32, %arg1: i32) -> (i32, i32, i32) {
    %c0_i32 = arith.constant 0 : i32
    %c0_i32_0 = arith.constant 0 : i32
    return %arg0, %arg1, %c0_i32 : i32, i32, i32
  }
  func.func @transform_1(%arg0: i32, %arg1: i32) -> (i32, i32) {
    %c0_i32 = arith.constant 0 : i32
    %c0_i32_0 = arith.constant 0 : i32
    %c0_i32_1 = arith.constant 0 : i32
    return %c0_i32, %c0_i32_0 : i32, i32
  }
  func.func @transform_2(%arg0: i32, %arg1: i32) -> (i32, i32) {
    %c0_i32 = arith.constant 0 : i32
    %c0_i32_0 = arith.constant 0 : i32
    %c0_i32_1 = arith.constant 0 : i32
    return %c0_i32, %c0_i32_0 : i32, i32
  }
  func.func @transform_3(%arg0: i32, %arg1: i32) -> (i32, i32, i32, i32) {
    %c0_i32 = arith.constant 0 : i32
    %c0_i32_0 = arith.constant 0 : i32
    %c0_i32_1 = arith.constant 0 : i32
    return %arg0, %c0_i32, %arg1, %c0_i32_0 : i32, i32, i32, i32
  }
  func.func @transform_4(%arg0: i32, %arg1: i32) -> (i32, i32, i32, i32) {
    %c0_i32 = arith.constant 0 : i32
    %c0_i32_0 = arith.constant 0 : i32
    %c0_i32_1 = arith.constant 0 : i32
    return %arg0, %c0_i32, %arg1, %c0_i32_0 : i32, i32, i32, i32
  }
  func.func @transform_5(%arg0: i32, %arg1: i32) -> (i32, i32, i32, i32) {
    %c0_i32 = arith.constant 0 : i32
    %c0_i32_0 = arith.constant 0 : i32
    %c0_i32_1 = arith.constant 0 : i32
    return %arg0, %c0_i32, %arg1, %c0_i32_0 : i32, i32, i32, i32
  }
}

</mosaic_0001>

<bundles_post_ra>
// kernel: tpu_custom_call.1
= control target key start
LH: loop header
LB: loop body
LE: loop exit
PB: predicated region body
PF: predicated region fallthrough
CT: control target
= control target key end

     0   :  { %s3742_s0 = inlined_call_operand.hbm [shape: f32[2,512,256], index: 0, kind: input, shape index: {}]   ;;  %s3743_s1 = inlined_call_operand.hbm [shape: f32[256,768], index: 1, kind: input, shape index: {}]   ;;  %s3744_s2 = inlined_call_operand.hbm [shape: f32[1,768], index: 2, kind: input, shape index: {}]   ;;  %s3745_s3 = inlined_call_operand.hbm [shape: f32[2,2,512,128], index: 3, kind: output, shape index: {0}]   ;;  %s3746_s4 = inlined_call_operand.hbm [shape: f32[2,2,512,128], index: 4, kind: output, shape index: {1}]   ;;  %s3747_s5 = inlined_call_operand.hbm [shape: f32[2,2,512,128], index: 5, kind: output, shape index: {2}]  }
   0x1   :  { %3785 = sst [smem:[#allocation40_spill]] %s3743_s1 }
   0x2   :  { %3786 = sst [smem:[#allocation41_spill]] %s3744_s2 }
   0x3   :  { %3787 = sst [smem:[#allocation42_spill]] %s3746_s4 }
   0x4   :  { %3788 = sst [smem:[#allocation43_spill]] %s3747_s5 }
   0x5   :  { %11 = vsyncpa [#allocation3], 0 }
   0x6   :  { %13 = vsyncpa [#allocation3 + $0x1], 0 }
   0x7   :  { %14 = vsyncpa [#allocation6], 0 }
   0x8   :  { %15 = vsyncpa [#allocation4], 0 }
   0x9   :  { %17 = vsyncpa [#allocation4 + $0x1], 0 }
   0xa   :  { %18 = vsyncpa [#allocation10], 0 }
   0xb   :  { %20 = vsyncpa [#allocation10 + $0x1], 0  ;;  %s2624_s18 = smov 0   ;;  %s2626_s19 = smov 0  }
   0xc   :  { %s2628_s20 = smov 0   ;;  %s2630_s21 = smov 0  }
   0xd   :  { %s2632_s22 = smov 0   ;;  %s2634_s23 = smov 0  }
   0xe   :  { %s2636_s24 = smov 0   ;;  %s2638_s25 = smov 0  }
   0xf LB: > { %3789 = sst [smem:[#allocation22_spill]] %s2536_s18  ;;  %s2665_s26 = sadd.s32 4294967295, %s2564_s25   ;;  %s2564_s25 = sphi %s2638_s25, %s26_s25   ;;  %s2560_s24 = sphi %s2636_s24, %s3849_s24   ;;  %s2556_s23 = sphi %s2634_s23, %s3848_s23   ;;  %s2552_s22 = sphi %s2632_s22, %s3847_s22   ;;  %s2548_s21 = sphi %s2630_s21, %s3846_s21   ;;  %s2544_s20 = sphi %s2628_s20, %s3845_s20   ;;  %s2540_s19 = sphi %s2626_s19, %s3844_s19   ;;  %s2536_s18 = sphi %s2624_s18, %s3843_s18  }
  0x10   : > { %s3751_s27 = sadd.s32 4294967294, %s2564_s25   ;;  %p60_p0 = scmp.ne.s32.totalorder %s2540_s19, %s2536_s18 }
  0x11   : > { %p3748_p1 = scmp.eq.s32.totalorder %s2665_s26, 0  ;;  %p134_p3 = scmp.eq.s32.totalorder %s3751_s27, 3 }
  0x12   : > { %p1896_p5 = scmp.ge.s32.totalorder %s2564_s25, 1  ;;  %p197_p7 = scmp.lt.s32.totalorder %s2564_s25, 5 }
  0x13   : > { %p2676_p4 = por %p3748_p1, %p60_p0  ;;  %p2681_p6 = por %p134_p3, %p60_p0 }
  0x14   : > { %p2686_p8 = pnand %p1896_p5, %p197_p7  ;;  %s2566_s6 = smov [#allocation5]  }
  0x15   : > { %s3790_s28 = scalar_select %p2676_p4, 1, 0 }
  0x16   : > { %s3791_s29 = scalar_select %p2681_p6, 1, 0 }
  0x17   : > { %s3793_s30 = scalar_select %p2686_p8, 1, 0 }
  0x18   : > { %3792 = sst [smem:[#allocation23_spill]] %s3791_s29  ;;  %s209_s7 = sshll.u32 %s2566_s6, 4  ;;  %s210_s7 = int_to_ptr.vmem [resolvable:$true] %s209_s7 }
  0x19   : > { %p2281_p9 = pneg %p2686_p8  ;;  %s2567_s9 = smov [#allocation7]  }
  0x1a   : > { %s223_s10 = sshll.u32 %s2567_s9, 4  ;;  %s3795_s1 = sld [smem:[#allocation40_spill]]  ;;  %s2698_s10 = int_to_ptr.vmem [resolvable:$true] %s223_s10 }
  0x1b   : > { %p2694_p10 = pnand %p2281_p9, %p3748_p1 }
  0x1d   : > { %p2402_p12 = pneg %p2694_p10 }
  0x20   : > { %s2400_s13 = scalar_lea.hbm %s3795_s1, 24576 }
  0x21   : > { %p2401_p11 = scmp.ne.s32.totalorder %s3795_s1, %s2400_s13  ;;  %p2407_p3 = scmp.lt.u32.totalorder %s2400_s13, %s3795_s1 }
  0x23   : > { %p2403_p13 = pnand %p2402_p12, %p2401_p11 }
  0x25   : > { %p2404_p0 = pneg %p2403_p13 }
  0x27   : > { %p2409_p5 = pnand %p2407_p3, %p2404_p0 }
  0x29   : > { %2412 = shalt.err (!%p2409_p5)
}
  0x2a   : > { %s2413_s6 = scalar_lea.vmem %s210_s7, 24576  ;;  %p2421_p2 = scmp.lt.s32.totalorder %s210_s7, %s210_s7 }
  0x2b   : > { %p2414_p7 = scmp.ne.s32.totalorder %s210_s7, %s2413_s6  ;;  %p2422_p6 = scmp.lt.s32.totalorder %s2413_s6, %s2413_s6 }
  0x2d   : > { %p2416_p9 = pnand %p2414_p7, %p2402_p12  ;;  %p2423_p4 = por %p2422_p6, %p2421_p2 }
  0x2f   : > { %p2417_p1 = pneg %p2416_p9 }
  0x31   : > { %p2424_p8 = pnand %p2423_p4, %p2417_p1 }
  0x33   : > { %2427 = shalt.err (!%p2424_p8)
}
  0x34   : > { %s2568_s9 = smov 768   ;;  %s2569_s11 = smov 48  }
  0x35   : > { %2284 = dma.hbm_to_vmem [thread:$0]  (!%p2694_p10), %s3795_s1, 24576, %s210_s7, [#allocation6], %s2568_s9, %s2568_s9, %s2569_s11  }
  0x36   : > { %s3796_s2 = sld [smem:[#allocation41_spill]] }
  0x3c   : > { %s2428_s16 = scalar_lea.hbm %s3796_s2, 96 }
  0x3d   : > { %p2429_p11 = scmp.ne.s32.totalorder %s3796_s2, %s2428_s16  ;;  %p2435_p4 = scmp.lt.u32.totalorder %s2428_s16, %s3796_s2 }
  0x3f   : > { %p2431_p1 = pnand %p2429_p11, %p2402_p12 }
  0x41   : > { %p2432_p2 = pneg %p2431_p1 }
  0x43   : > { %p2437_p6 = pnand %p2435_p4, %p2432_p2 }
  0x45   : > { %2440 = shalt.err (!%p2437_p6)
}
  0x46   : > { %s2441_s7 = scalar_lea.vmem %s2698_s10, 96  ;;  %p2449_p3 = scmp.lt.s32.totalorder %s2698_s10, %s2698_s10 }
  0x47   : > { %p2442_p8 = scmp.ne.s32.totalorder %s2698_s10, %s2441_s7  ;;  %p2450_p5 = scmp.lt.s32.totalorder %s2441_s7, %s2441_s7 }
  0x49   : > { %p2444_p13 = pnand %p2442_p8, %p2402_p12  ;;  %p2451_p7 = por %p2450_p5, %p2449_p3 }
  0x4b   : > { %p2445_p0 = pneg %p2444_p13 }
  0x4d   : > { %p2452_p9 = pnand %p2451_p7, %p2445_p0 }
  0x4f   : > { %2455 = shalt.err (!%p2452_p9)
}
  0x50   : > { %2287 = dma.hbm_to_vmem [thread:$0]  (!%p2694_p10), %s3796_s2, 96, %s2698_s10, [#allocation6]  }
  0x51   : > { %s35_s9 = sadd.s32 1, %s2556_s23  ;;  %s38_s11 = sadd.s32 1, %s2560_s24 }
  0x52   : > { %p36_p12 = scmp.ge.s32.totalorder %s35_s9, 2  ;;  %s47_s8 = sadd.s32 1, %s2544_s20 }
  0x53   : > { %p54_p11 = scmp.ne.s32.totalorder %s2544_s20, %s2540_s19  ;;  %p55_p1 = scmp.eq.s32.totalorder %s2564_s25, 0 }
  0x54   : > { %s3851_s9 = smov (%p36_p12, %s35_s9), 0  ;;  %s3853_s11 = smov (!%p36_p12, %s38_s11), %s2560_s24 }
  0x55   : > { %3797 = sst [smem:[#allocation24_spill]] %s3851_s9  ;;  %s43_s12 = ssub.s32 %s2556_s23, %s3851_s9 }
  0x56   : > { %p2758_p2 = por %p55_p1, %p54_p11  ;;  %p40_p10 = scmp.ge.s32.totalorder %s3853_s11, 2 }
  0x57   : > { %p3799_p4 = scmp.eq.s32.totalorder %s2665_s26, 3  ;;  %p2304_p8 = scmp.lt.s32.totalorder %s2564_s25, 4 }
  0x58   : > { %s234_s14 = sand.u32 1, %s2544_s20   ;;  %s3855_s11 = smov (%p40_p10, %s3853_s11), 0 }
  0x59   : > { %p2764_p6 = por %p3799_p4, %p54_p11  ;;  %s1900_s15 = sshll.u32 %s234_s14, 9 }
  0x5a   : > { %s42_s16 = ssub.s32 %s2560_s24, %s3855_s11  ;;  %s2022_s6 = sshll.u32 %s2556_s23, 6 }
  0x5b   : > { %s44_s17 = sor.u32 %s43_s12, %s42_s16  ;;  %s1903_s7 = sshll.u32 %s2560_s24, 7 }
  0x5c   : > { %p45_p13 = scmp.eq.s32.totalorder %s44_s17, 0  ;;  %s245_s27 = sadd.s32 %s2022_s6, %s1903_s7 }
  0x5d   : > { %s238_s29 = scalar_lea.vmem [#allocation2], %s1900_s15  ;;  %s1904_s9 = sshll.u32 %s245_s27, 7 }
  0x5e   : > { %s248_s1 = sshll.u32 %s238_s29, 4  ;;  %s2784_s4 = scalar_lea.hbm %s3742_s0, %s1904_s9  ;;  %s2779_s1 = int_to_ptr.vmem [resolvable:$true] %s248_s1 }
  0x5f   : > { %s2777_s2 = scalar_select %p45_p13, %s2544_s20, %s47_s8  }
  0x60   : > { %p2790_p0 = pnand %p2304_p8, %p2758_p2  ;;  %s2794_s8 = scalar_lea.sflag [#allocation3], %s234_s14 }
  0x61   : > { %s2456_s15 = scalar_lea.hbm %s2784_s4, 8192  ;;  %s2461_s9 = scalar_lea.hbm %s3742_s0, 32768 }
  0x62   : > { %p2457_p3 = scmp.ne.s32.totalorder %s2784_s4, %s2456_s15  ;;  %p2458_p5 = pneg %p2790_p0 }
  0x63   : > { %p2462_p12 = scmp.lt.u32.totalorder %s2784_s4, %s3742_s0  ;;  %p2463_p11 = scmp.lt.u32.totalorder %s2461_s9, %s2456_s15 }
  0x64   : > { %p2459_p7 = pnand %p2458_p5, %p2457_p3  ;;  %p2465_p2 = scmp.lt.u32.totalorder %s2456_s15, %s2784_s4 }
  0x65   : > { %p2464_p1 = por %p2463_p11, %p2462_p12 }
  0x66   : > { %p2460_p9 = pneg %p2459_p7 }
  0x67   : > { %p2466_p10 = por %p2465_p2, %p2464_p1 }
  0x69   : > { %p2467_p4 = pnand %p2466_p10, %p2460_p9 }
  0x6b   : > { %2470 = shalt.err (!%p2467_p4)
}
  0x6c   : > { %s2471_s14 = scalar_lea.vmem %s2779_s1, 8192  ;;  %s2570_s17 = smov [#allocation2]  }
  0x6d   : > { %p2472_p8 = scmp.ne.s32.totalorder %s2779_s1, %s2471_s14  ;;  %s2476_s6 = sshll.u32 %s2570_s17, 4  ;;  %s2477_s6 = int_to_ptr.vmem [resolvable:$false] %s2476_s6 }
  0x6e   : > { %s2478_s7 = scalar_lea.vmem %s2477_s6, 16384  ;;  %p2479_p7 = scmp.lt.s32.totalorder %s2779_s1, %s2477_s6 }
  0x6f   : > { %p2474_p13 = pnand %p2472_p8, %p2458_p5  ;;  %p2480_p12 = scmp.lt.s32.totalorder %s2478_s7, %s2471_s14 }
  0x71   : > { %p2475_p3 = pneg %p2474_p13  ;;  %p2481_p11 = por %p2480_p12, %p2479_p7 }
  0x73   : > { %p2482_p1 = pnand %p2481_p11, %p2475_p3 }
  0x75   : > { %2485 = shalt.err (!%p2482_p1)
}
  0x76   : > { %s2571_s27 = smov 256   ;;  %s2572_s29 = smov 16  }
  0x77   : > { %2291 = dma.hbm_to_vmem [thread:$0]  (!%p2790_p0), %s2784_s4, 8192, %s2779_s1, %s2794_s8, %s2571_s27, %s2571_s27, %s2572_s29  }
  0x78   : > { %p3802_p5 = scmp.ne.s32.totalorder %s3793_s30, 0 }
  0x7a   : > { %260 = sbr.rel (%p3802_p5) target bundleno = 636 (0x27c), region = 32 }
  0x81   : > { %s2825_s15 = sand.u32 1, %s2540_s19   ;;  %p3803_p9 = scmp.ne.s32.totalorder %s3790_s28, 0 }
  0x82   : > { %s2828_s5 = sshll.u32 %s2825_s15, 9  ;;  %s263_s18 = scalar_lea.sflag [#allocation3], %s2825_s15 }
  0x83   : > { %s2832_s9 = scalar_lea.vmem [#allocation2], %s2828_s5 }
  0x84   : > { %2519 = dma.done.wait (%p3803_p9), %s263_s18, 8192  }
  0x85   : > { %2521 = vsyncadd (%p3803_p9), %s263_s18, 4294959104  ;;  %p3804_p0 = scmp.eq.s32.totalorder %s2665_s26, 0 }
  0x87   : > { %2523 = dma.done.wait (%p3804_p0), [#allocation6], 24672   ;;  %p3805_p2 = pmov %p3804_p0 }
  0x88   : > { %v380_v0 = vld [vmem:[#allocation5 + $0x8] sm:$0xff]  ;;  %v386_v1 = vld [vmem:[#allocation5 + $0x38] sm:$0xff]  ;;  %v379_v2 = vld [vmem:[#allocation5] sm:$0xff]  ;;  %s3239_s1 = scalar_lea.vmem [#allocation8], %s2828_s5  ;;  %s1574_s4 = sand.u32 1, %s2665_s26  }
  0x89   : > { %2525 = vsyncadd (%p3805_p2), [#allocation6], 4294942624  ;;  %v2023_v3 = vpack.c.bf16 %v386_v1, %v380_v0  ;;  %v385_v4 = vld [vmem:[#allocation5 + $0x30] sm:$0xff]  ;;  %v392_v5 = vld [vmem:[#allocation5 + $0x68] sm:$0xff]  ;;  %s3387_s28 = scalar_lea.vmem [#allocation9], %s2828_s5  ;;  %s3391_s30 = scalar_lea.vmem [#allocation11], %s2828_s5 }
  0x8a   : > { %v398_v6 = vld [vmem:[#allocation5 + $0x98] sm:$0xff]  ;;  %v2025_v7 = vpack.c.bf16 %v385_v4, %v379_v2  ;;  %v391_v9 = vld [vmem:[#allocation5 + $0x60] sm:$0xff]  ;;  %v397_v10 = vld [vmem:[#allocation5 + $0x90] sm:$0xff]  ;;  %s1570_s12 = scalar_lea.sflag [#allocation4], %s2825_s15  ;;  %s3647_s8 = scalar_lea.sflag [#allocation10], %s1574_s4 }
  0x8b   : > { %v2027_v8 = vpack.c.bf16 %v398_v6, %v392_v5  ;;  %v404_v11 = vld [vmem:[#allocation5 + $0xc8] sm:$0xff]  ;;  %2024 = vmatprep.subr.bf16.mxu0 %v2023_v3  ;;  %2215 = vmatprep.subr.bf16.mxu1 %v2023_v3  ;;  %v410_v12 = vld [vmem:[#allocation5 + $0xf8] sm:$0xff]  ;;  %v2029_v13 = vpack.c.bf16 %v397_v10, %v391_v9  ;;  %v403_v15 = vld [vmem:[#allocation5 + $0xc0] sm:$0xff] }
  0x8c   : > { %2026 = vmatpush1.bf16.msra.mxu0 %v2025_v7  ;;  %2231 = vmatpush1.bf16.msra.mxu1 %v2025_v7  ;;  %v2031_v14 = vpack.c.bf16 %v410_v12, %v404_v11  ;;  %v409_v16 = vld [vmem:[#allocation5 + $0xf0] sm:$0xff]  ;;  %v416_v17 = vld [vmem:[#allocation5 + $0x128] sm:$0xff]  ;;  %v422_v18 = vld [vmem:[#allocation5 + $0x158] sm:$0xff] }
  0x8d   : > { %2028 = vmatprep.subr.bf16.mxu0 %v2027_v8  ;;  %2216 = vmatprep.subr.bf16.mxu1 %v2027_v8  ;;  %v2033_v19 = vpack.c.bf16 %v409_v16, %v403_v15  ;;  %v2035_v20 = vpack.c.bf16 %v422_v18, %v416_v17  ;;  %v415_v21 = vld [vmem:[#allocation5 + $0x120] sm:$0xff]  ;;  %v421_v22 = vld [vmem:[#allocation5 + $0x150] sm:$0xff]  ;;  %v428_v23 = vld [vmem:[#allocation5 + $0x188] sm:$0xff] }
  0x8e   : > { %v434_v24 = vld [vmem:[#allocation5 + $0x1b8] sm:$0xff]  ;;  %v2037_v25 = vpack.c.bf16 %v421_v22, %v415_v21  ;;  %v427_v27 = vld [vmem:[#allocation5 + $0x180] sm:$0xff]  ;;  %v433_v28 = vld [vmem:[#allocation5 + $0x1b0] sm:$0xff] }
  0x8f   : > { %v2039_v26 = vpack.c.bf16 %v434_v24, %v428_v23  ;;  %v440_v29 = vld [vmem:[#allocation5 + $0x1e8] sm:$0xff]  ;;  %v446_v30 = vld [vmem:[#allocation5 + $0x218] sm:$0xff]  ;;  %v2041_v31 = vpack.c.bf16 %v433_v28, %v427_v27  ;;  %v439_v33 = vld [vmem:[#allocation5 + $0x1e0] sm:$0xff] }
  0x90   : > { %2030 = vmatpush1.bf16.msra.mxu0 %v2029_v13  ;;  %2232 = vmatpush1.bf16.msra.mxu1 %v2029_v13  ;;  %v2043_v32 = vpack.c.bf16 %v446_v30, %v440_v29  ;;  %v445_v34 = vld [vmem:[#allocation5 + $0x210] sm:$0xff]  ;;  %v452_v35 = vld [vmem:[#allocation5 + $0x248] sm:$0xff]  ;;  %v458_v36 = vld [vmem:[#allocation5 + $0x278] sm:$0xff] }
  0x91   : > { %2032 = vmatprep.subr.bf16.mxu0 %v2031_v14  ;;  %2217 = vmatprep.subr.bf16.mxu1 %v2031_v14  ;;  %v2045_v37 = vpack.c.bf16 %v445_v34, %v439_v33  ;;  %v451_v38 = vld [vmem:[#allocation5 + $0x240] sm:$0xff]  ;;  %v2047_v39 = vpack.c.bf16 %v458_v36, %v452_v35  ;;  %v457_v40 = vld [vmem:[#allocation5 + $0x270] sm:$0xff]  ;;  %v2843_v41 = vld [vmem:[%s2832_s9 + $0x8] sm:$0xff] }
  0x92   : > { %v348_v42 = vld [vmem:[%s2832_s9 + $0x108] sm:$0xff]  ;;  %v470_v44 = vld [vmem:[#allocation5 + $0x2d8] sm:$0xff]  ;;  %667 = vmatprep.mubr.f32.mxu0 %v2843_v41  ;;  %v2049_v45 = vpack.c.bf16 %v457_v40, %v451_v38  ;;  %v463_v47 = vld [vmem:[#allocation5 + $0x2a0] sm:$0xff] }
  0x93   : > { %v464_v43 = vld [vmem:[#allocation5 + $0x2a8] sm:$0xff]  ;;  %763 = vmatprep.mubr.f32.mxu1 %v348_v42  ;;  %v469_v48 = vld [vmem:[#allocation5 + $0x2d0] sm:$0xff]  ;;  %v482_v50 = vld [vmem:[#allocation5 + $0x338] sm:$0xff] }
  0x94   : > { %2034 = vmatpush1.bf16.msra.mxu0 %v2033_v19  ;;  %2233 = vmatpush1.bf16.msra.mxu1 %v2033_v19  ;;  %v2051_v46 = vpack.c.bf16 %v470_v44, %v464_v43  ;;  %v476_v49 = vld [vmem:[#allocation5 + $0x308] sm:$0xff]  ;;  %v2053_v51 = vpack.c.bf16 %v469_v48, %v463_v47  ;;  %v475_v53 = vld [vmem:[#allocation5 + $0x300] sm:$0xff]  ;;  %v481_v54 = vld [vmem:[#allocation5 + $0x330] sm:$0xff] }
  0x95   : > { %2036 = vmatprep.subr.bf16.mxu0 %v2035_v20  ;;  %2218 = vmatprep.subr.bf16.mxu1 %v2035_v20  ;;  %v2055_v52 = vpack.c.bf16 %v482_v50, %v476_v49  ;;  %v488_v55 = vld [vmem:[#allocation5 + $0x368] sm:$0xff]  ;;  %v494_v56 = vld [vmem:[#allocation5 + $0x398] sm:$0xff]  ;;  %v2057_v57 = vpack.c.bf16 %v481_v54, %v475_v53  ;;  %v487_v59 = vld [vmem:[#allocation5 + $0x360] sm:$0xff] }
  0x96   : > { %v2059_v58 = vpack.c.bf16 %v494_v56, %v488_v55  ;;  %v493_v60 = vld [vmem:[#allocation5 + $0x390] sm:$0xff]  ;;  %v500_v61 = vld [vmem:[#allocation5 + $0x3c8] sm:$0xff]  ;;  %v506_v62 = vld [vmem:[#allocation5 + $0x3f8] sm:$0xff] }
  0x97   : > { %v2061_v63 = vpack.c.bf16 %v493_v60, %v487_v59  ;;  %v2063_v0 = vpack.c.bf16 %v506_v62, %v500_v61  ;;  %v499_v1 = vld [vmem:[#allocation5 + $0x3c0] sm:$0xff]  ;;  %v505_v2 = vld [vmem:[#allocation5 + $0x3f0] sm:$0xff]  ;;  %v512_v3 = vld [vmem:[#allocation5 + $0x428] sm:$0xff] }
  0x98   : > { %2038 = vmatpush1.bf16.msra.mxu0 %v2037_v25  ;;  %2234 = vmatpush1.bf16.msra.mxu1 %v2037_v25  ;;  %v518_v4 = vld [vmem:[#allocation5 + $0x458] sm:$0xff]  ;;  %v2065_v5 = vpack.c.bf16 %v505_v2, %v499_v1  ;;  %v511_v7 = vld [vmem:[#allocation5 + $0x420] sm:$0xff]  ;;  %v517_v8 = vld [vmem:[#allocation5 + $0x450] sm:$0xff] }
  0x99   : > { %2040 = vmatprep.subr.bf16.mxu0 %v2039_v26  ;;  %2219 = vmatprep.subr.bf16.mxu1 %v2039_v26  ;;  %v2067_v6 = vpack.c.bf16 %v518_v4, %v512_v3  ;;  %v524_v9 = vld [vmem:[#allocation5 + $0x488] sm:$0xff]  ;;  %v530_v10 = vld [vmem:[#allocation5 + $0x4b8] sm:$0xff]  ;;  %v2069_v11 = vpack.c.bf16 %v517_v8, %v511_v7  ;;  %v523_v13 = vld [vmem:[#allocation5 + $0x480] sm:$0xff] }
  0x9a   : > { %v2071_v12 = vpack.c.bf16 %v530_v10, %v524_v9  ;;  %v529_v14 = vld [vmem:[#allocation5 + $0x4b0] sm:$0xff]  ;;  %v536_v15 = vld [vmem:[#allocation5 + $0x4e8] sm:$0xff]  ;;  %v542_v16 = vld [vmem:[#allocation5 + $0x518] sm:$0xff] }
  0x9b   : > { %v2073_v17 = vpack.c.bf16 %v529_v14, %v523_v13  ;;  %v2075_v18 = vpack.c.bf16 %v542_v16, %v536_v15  ;;  %v535_v19 = vld [vmem:[#allocation5 + $0x4e0] sm:$0xff]  ;;  %v541_v20 = vld [vmem:[#allocation5 + $0x510] sm:$0xff]  ;;  %v548_v21 = vld [vmem:[#allocation5 + $0x548] sm:$0xff] }
  0x9c   : > { %2042 = vmatpush1.bf16.msra.mxu0 %v2041_v31  ;;  %2235 = vmatpush1.bf16.msra.mxu1 %v2041_v31  ;;  %v554_v22 = vld [vmem:[#allocation5 + $0x578] sm:$0xff]  ;;  %v2077_v23 = vpack.c.bf16 %v541_v20, %v535_v19  ;;  %v547_v25 = vld [vmem:[#allocation5 + $0x540] sm:$0xff]  ;;  %v553_v26 = vld [vmem:[#allocation5 + $0x570] sm:$0xff] }
  0x9d   : > { %2044 = vmatprep.subr.bf16.mxu0 %v2043_v32  ;;  %2220 = vmatprep.subr.bf16.mxu1 %v2043_v32  ;;  %v2079_v24 = vpack.c.bf16 %v554_v22, %v548_v21  ;;  %v560_v27 = vld [vmem:[#allocation5 + $0x5a8] sm:$0xff]  ;;  %v566_v28 = vld [vmem:[#allocation5 + $0x5d8] sm:$0xff]  ;;  %v2081_v29 = vpack.c.bf16 %v553_v26, %v547_v25  ;;  %v559_v31 = vld [vmem:[#allocation5 + $0x5a0] sm:$0xff] }
  0x9e   : > { %v2083_v30 = vpack.c.bf16 %v566_v28, %v560_v27  ;;  %v565_v32 = vld [vmem:[#allocation5 + $0x5d0] sm:$0xff]  ;;  %v382_v33 = vld [vmem:[#allocation5 + $0x18] sm:$0xff]  ;;  %v388_v34 = vld [vmem:[#allocation5 + $0x48] sm:$0xff] }
  0x9f   : > { %v384_v35 = vld [vmem:[#allocation5 + $0x28] sm:$0xff]  ;;  %v390_v36 = vld [vmem:[#allocation5 + $0x58] sm:$0xff]  ;;  %v381_v38 = vld [vmem:[#allocation5 + $0x10] sm:$0xff] }
  0xa0   : > { %2046 = vmatpush1.bf16.msra.mxu0 %v2045_v37  ;;  %2236 = vmatpush1.bf16.msra.mxu1 %v2045_v37  ;;  %v2085_v37 = vpack.c.bf16 %v565_v32, %v559_v31  ;;  %v2151_v40 = vpack.c.bf16 %v390_v36, %v384_v35  ;;  %v387_v42 = vld [vmem:[#allocation5 + $0x40] sm:$0xff]  ;;  %v389_v44 = vld [vmem:[#allocation5 + $0x50] sm:$0xff]  ;;  %v396_v47 = vld [vmem:[#allocation5 + $0x88] sm:$0xff] }
  0xa1   : > { %2048 = vmatprep.subr.bf16.mxu0 %v2047_v39  ;;  %2221 = vmatprep.subr.bf16.mxu1 %v2047_v39  ;;  %v2087_v39 = vpack.c.bf16 %v388_v34, %v382_v33  ;;  %v383_v43 = vld [vmem:[#allocation5 + $0x20] sm:$0xff]  ;;  %v402_v48 = vld [vmem:[#allocation5 + $0xb8] sm:$0xff]  ;;  %v393_v53 = vld [vmem:[#allocation5 + $0x70] sm:$0xff] }
  0xa2   : > { %v2848_v49 = vld [vmem:[%s2832_s9] sm:$0xff]  ;;  %v401_v56 = vld [vmem:[#allocation5 + $0xb0] sm:$0xff]  ;;  %v2155_v60 = vpack.c.bf16 %v402_v48, %v396_v47  ;;  %v406_v61 = vld [vmem:[#allocation5 + $0xd8] sm:$0xff] }
  0xa3   : > { %v2851_v50 = vld [vmem:[%s2832_s9 + $0x100] sm:$0xff]  ;;  %v412_v62 = vld [vmem:[#allocation5 + $0x108] sm:$0xff]  ;;  %v2862_v1 = vld [vmem:[%s2832_s9 + $0x10] sm:$0xff] }
  0xa4   : > { %2050 = vmatpush1.bf16.msra.mxu0 %v2049_v45  ;;  %2237 = vmatpush1.bf16.msra.mxu1 %v2049_v45  ;;  %v394_v45 = vld [vmem:[#allocation5 + $0x78] sm:$0xff]  ;;  %v399_v54 = vld [vmem:[#allocation5 + $0xa0] sm:$0xff]  ;;  %v2865_v2 = vld [vmem:[%s2832_s9 + $0x110] sm:$0xff] }
  0xa5   : > { %2052 = vmatprep.subr.bf16.mxu0 %v2051_v46  ;;  %2222 = vmatprep.subr.bf16.mxu1 %v2051_v46  ;;  %v400_v46 = vld [vmem:[#allocation5 + $0xa8] sm:$0xff]  ;;  %v395_v55 = vld [vmem:[#allocation5 + $0x80] sm:$0xff]  ;;  %v2093_v3 = vpack.c.bf16 %v399_v54, %v393_v53  ;;  %v413_v8 = vld [vmem:[#allocation5 + $0x110] sm:$0xff] }
  0xa6   : > { %v2091_v59 = vpack.c.bf16 %v400_v46, %v394_v45  ;;  %v2157_v4 = vpack.c.bf16 %v401_v56, %v395_v55  ;;  %v407_v7 = vld [vmem:[#allocation5 + $0xe0] sm:$0xff]  ;;  %v2870_v9 = vld [vmem:[%s2832_s9 + $0x28] sm:$0xff]  ;;  %v418_v13 = vld [vmem:[#allocation5 + $0x138] sm:$0xff] }
  0xa7   : > { %v2873_v10 = vld [vmem:[%s2832_s9 + $0x128] sm:$0xff]  ;;  %v426_v16 = vld [vmem:[#allocation5 + $0x178] sm:$0xff]  ;;  %v2161_v20 = vpack.c.bf16 %v413_v8, %v407_v7  ;;  %v417_v21 = vld [vmem:[#allocation5 + $0x130] sm:$0xff] }
  0xa8   : > { %2054 = vmatpush1.bf16.msra.mxu0 %v2053_v51  ;;  %2238 = vmatpush1.bf16.msra.mxu1 %v2053_v51  ;;  %v2089_v51 = vpack.c.bf16 %v387_v42, %v381_v38  ;;  %v424_v14 = vld [vmem:[#allocation5 + $0x168] sm:$0xff]  ;;  %v423_v22 = vld [vmem:[#allocation5 + $0x160] sm:$0xff]  ;;  %v2886_v25 = vld [vmem:[%s2832_s9 + $0x38] sm:$0xff] }
  0xa9   : > { %2056 = vmatprep.subr.bf16.mxu0 %v2055_v52  ;;  %2223 = vmatprep.subr.bf16.mxu1 %v2055_v52  ;;  %v2153_v52 = vpack.c.bf16 %v389_v44, %v383_v43  ;;  %v420_v15 = vld [vmem:[#allocation5 + $0x148] sm:$0xff]  ;;  %v2889_v26 = vld [vmem:[%s2832_s9 + $0x138] sm:$0xff]  ;;  %v2099_v27 = vpack.c.bf16 %v424_v14, %v418_v13  ;;  %v2894_v33 = vld [vmem:[%s2832_s9 + $0x30] sm:$0xff]  ;;  %v2101_v35 = vpack.c.bf16 %v423_v22, %v417_v21 }
  0xaa   : > { %v2163_v28 = vpack.c.bf16 %v426_v16, %v420_v15  ;;  %v432_v31 = vld [vmem:[#allocation5 + $0x1a8] sm:$0xff]  ;;  %v438_v32 = vld [vmem:[#allocation5 + $0x1d8] sm:$0xff]  ;;  %v2897_v34 = vld [vmem:[%s2832_s9 + $0x130] sm:$0xff] }
  0xab   : > { %v435_v38 = vld [vmem:[#allocation5 + $0x1c0] sm:$0xff]  ;;  %v2902_v42 = vld [vmem:[%s2832_s9 + $0x48] sm:$0xff]  ;;  %v2167_v45 = vpack.c.bf16 %v438_v32, %v432_v31  ;;  %v442_v46 = vld [vmem:[#allocation5 + $0x1f8] sm:$0xff] }
  0xac   : > { %2058 = vmatpush1.bf16.msra.mxu0 %v2057_v57  ;;  %2239 = vmatpush1.bf16.msra.mxu1 %v2057_v57  ;;  %v2854_v57 = vld [vmem:[%s2832_s9 + $0x18] sm:$0xff]  ;;  %v2905_v43 = vld [vmem:[%s2832_s9 + $0x148] sm:$0xff]  ;;  %v2913_v53 = vld [vmem:[%s2832_s9 + $0x140] sm:$0xff] }
  0xad   : > { %2060 = vmatprep.subr.bf16.mxu0 %v2059_v58  ;;  %2224 = vmatprep.subr.bf16.mxu1 %v2059_v58  ;;  %v2857_v58 = vld [vmem:[%s2832_s9 + $0x118] sm:$0xff]  ;;  %v448_v47 = vld [vmem:[#allocation5 + $0x228] sm:$0xff]  ;;  %v441_v56 = vld [vmem:[#allocation5 + $0x1f0] sm:$0xff] }
  0xae   : > { %v444_v48 = vld [vmem:[#allocation5 + $0x208] sm:$0xff]  ;;  %v462_v7 = vld [vmem:[#allocation5 + $0x298] sm:$0xff]  ;;  %v2926_v8 = vld [vmem:[%s2832_s9 + $0x50] sm:$0xff] }
  0xaf   : > { %v453_v14 = vld [vmem:[#allocation5 + $0x250] sm:$0xff]  ;;  %v459_v15 = vld [vmem:[#allocation5 + $0x280] sm:$0xff]  ;;  %v2937_v21 = vld [vmem:[%s2832_s9 + $0x168] sm:$0xff] }
  0xb0   : > { %2062 = vmatpush1.bf16.msra.mxu0 %v2061_v63  ;;  %2240 = vmatpush1.bf16.msra.mxu1 %v2061_v63  ;;  %v408_v63 = vld [vmem:[#allocation5 + $0xe8] sm:$0xff]  ;;  %v455_v16 = vld [vmem:[#allocation5 + $0x260] sm:$0xff]  ;;  %v2113_v32 = vpack.c.bf16 %v459_v15, %v453_v14 }
  0xb1   : > { %2064 = vmatprep.subr.bf16.mxu0 %v2063_v0  ;;  %2225 = vmatprep.subr.bf16.mxu1 %v2063_v0  ;;  %v414_v0 = vld [vmem:[#allocation5 + $0x118] sm:$0xff]  ;;  %v2945_v31 = vld [vmem:[%s2832_s9 + $0x160] sm:$0xff]  ;;  %v496_v14 = vld [vmem:[#allocation5 + $0x3a8] sm:$0xff] }
  0xb2   : > { %3806 = vst [vmem:[#allocation25_spill] sm:$0xff] %v2945_v31  ;;  %v492_v15 = vld [vmem:[#allocation5 + $0x388] sm:$0xff] }
  0xb4   : > { %2066 = vmatpush1.bf16.msra.mxu0 %v2065_v5  ;;  %2241 = vmatpush1.bf16.msra.mxu1 %v2065_v5  ;;  %v405_v5 = vld [vmem:[#allocation5 + $0xd0] sm:$0xff] }
  0xb5   : > { %2068 = vmatprep.subr.bf16.mxu0 %v2067_v6  ;;  %2226 = vmatprep.subr.bf16.mxu1 %v2067_v6  ;;  %v411_v6 = vld [vmem:[#allocation5 + $0x100] sm:$0xff] }
  0xb6   : > { %v2097_v19 = vpack.c.bf16 %v411_v6, %v405_v5  ;;  %v460_v5 = vld [vmem:[#allocation5 + $0x288] sm:$0xff] }
  0xb7   : > { %v456_v6 = vld [vmem:[#allocation5 + $0x268] sm:$0xff] }
  0xb8   : > { %2070 = vmatpush1.bf16.msra.mxu0 %v2069_v11  ;;  %2242 = vmatpush1.bf16.msra.mxu1 %v2069_v11  ;;  %v2095_v11 = vpack.c.bf16 %v412_v62, %v406_v61  ;;  %v449_v61 = vld [vmem:[#allocation5 + $0x230] sm:$0xff]  ;;  %v2918_v62 = vld [vmem:[%s2832_s9 + $0x58] sm:$0xff] }
  0xb9   : > { %2072 = vmatprep.subr.bf16.mxu0 %v2071_v12  ;;  %2227 = vmatprep.subr.bf16.mxu1 %v2071_v12  ;;  %v2159_v12 = vpack.c.bf16 %v414_v0, %v408_v63  ;;  %v2921_v63 = vld [vmem:[%s2832_s9 + $0x158] sm:$0xff]  ;;  %v2107_v0 = vpack.c.bf16 %v448_v47, %v442_v46 }
  0xba   : > { %v478_v47 = vld [vmem:[#allocation5 + $0x318] sm:$0xff] }
  0xbc   : > { %2074 = vmatpush1.bf16.msra.mxu0 %v2073_v17  ;;  %2243 = vmatpush1.bf16.msra.mxu1 %v2073_v17  ;;  %v2878_v17 = vld [vmem:[%s2832_s9 + $0x20] sm:$0xff] }
  0xbd   : > { %2076 = vmatprep.subr.bf16.mxu0 %v2075_v18  ;;  %2228 = vmatprep.subr.bf16.mxu1 %v2075_v18  ;;  %v2881_v18 = vld [vmem:[%s2832_s9 + $0x120] sm:$0xff] }
  0xc0   : > { %2078 = vmatpush1.bf16.msra.mxu0 %v2077_v23  ;;  %2244 = vmatpush1.bf16.msra.mxu1 %v2077_v23  ;;  %v419_v23 = vld [vmem:[#allocation5 + $0x140] sm:$0xff] }
  0xc1   : > { %2080 = vmatprep.subr.bf16.mxu0 %v2079_v24  ;;  %2229 = vmatprep.subr.bf16.mxu1 %v2079_v24  ;;  %v425_v24 = vld [vmem:[#allocation5 + $0x170] sm:$0xff] }
  0xc2   : > { %v2165_v36 = vpack.c.bf16 %v425_v24, %v419_v23  ;;  %v2175_v23 = vpack.c.bf16 %v462_v7, %v456_v6  ;;  %v466_v24 = vld [vmem:[#allocation5 + $0x2b8] sm:$0xff]  ;;  %v2969_v6 = vld [vmem:[%s2832_s9 + $0x188] sm:$0xff] }
  0xc3   : > { %3809 = vst [vmem:[#allocation28_spill] sm:$0xff] %v2969_v6 }
  0xc4   : > { %2082 = vmatpush1.bf16.msra.mxu0 %v2081_v29  ;;  %2245 = vmatpush1.bf16.msra.mxu1 %v2081_v29  ;;  %v430_v29 = vld [vmem:[#allocation5 + $0x198] sm:$0xff] }
  0xc5   : > { %2084 = vmatprep.subr.bf16.mxu0 %v2083_v30  ;;  %2230 = vmatprep.subr.bf16.mxu1 %v2083_v30  ;;  %v436_v30 = vld [vmem:[#allocation5 + $0x1c8] sm:$0xff] }
  0xc6   : > { %v2103_v44 = vpack.c.bf16 %v436_v30, %v430_v29  ;;  %v474_v29 = vld [vmem:[#allocation5 + $0x2f8] sm:$0xff]  ;;  %v2942_v30 = vld [vmem:[%s2832_s9 + $0x60] sm:$0xff] }
  0xc8   : > { %2086 = vmatpush1.bf16.msra.mxu0 %v2085_v37  ;;  %2246 = vmatpush1.bf16.msra.mxu1 %v2085_v37  ;;  %v429_v37 = vld [vmem:[#allocation5 + $0x190] sm:$0xff] }
  0xc9   : > { %2088 = vmatprep.subr.bf16.mxu1 %v2087_v39  ;;  %2152 = vmatprep.subr.bf16.mxu0 %v2151_v40  ;;  %v431_v39 = vld [vmem:[#allocation5 + $0x1a0] sm:$0xff]  ;;  %v437_v40 = vld [vmem:[#allocation5 + $0x1d0] sm:$0xff]  ;;  %v2105_v54 = vpack.c.bf16 %v435_v38, %v429_v37 }
  0xca   : > { %v2169_v55 = vpack.c.bf16 %v437_v40, %v431_v39  ;;  %v471_v37 = vld [vmem:[#allocation5 + $0x2e0] sm:$0xff]  ;;  %v473_v39 = vld [vmem:[#allocation5 + $0x2f0] sm:$0xff]  ;;  %v2950_v40 = vld [vmem:[%s2832_s9 + $0x78] sm:$0xff] }
  0xcb   : > { %668 = vmatmul.mubr.f32.vlgmr.msra.gmra.mrb[0].mxu0 %v2848_v49  ;;  %764 = vmatmul.mubr.f32.vlgmr.msra.gmra.mrb[0].mxu1 %v2851_v50  ;;  %v467_v38 = vld [vmem:[#allocation5 + $0x2c0] sm:$0xff] }
  0xcc   : > { %2090 = vmatpush1.bf16.msra.mxu1 %v2089_v51  ;;  %2154 = vmatpush1.bf16.msra.mxu0 %v2153_v52  ;;  %v450_v51 = vld [vmem:[#allocation5 + $0x238] sm:$0xff]  ;;  %v2910_v52 = vld [vmem:[%s2832_s9 + $0x40] sm:$0xff] }
  0xcd   : > { %673 = vmatprep.mubr.f32.mxu0 %v2854_v57  ;;  %769 = vmatprep.mubr.f32.mxu1 %v2857_v58 }
  0xce   : > { %2092 = vmatprep.subr.bf16.mxu1 %v2091_v59  ;;  %2156 = vmatprep.subr.bf16.mxu0 %v2155_v60  ;;  %v447_v59 = vld [vmem:[#allocation5 + $0x220] sm:$0xff] }
  0xcf   : > { %674 = vmatmul.mubr.f32.gmra.mrb[2].mxu0 %v2862_v1  ;;  %770 = vmatmul.mubr.f32.gmra.mrb[2].mxu1 %v2865_v2  ;;  %v443_v60 = vld [vmem:[#allocation5 + $0x200] sm:$0xff] }
  0xd0   : > { %2094 = vmatpush1.bf16.msra.mxu1 %v2093_v3  ;;  %2158 = vmatpush1.bf16.msra.mxu0 %v2157_v4  ;;  %v2171_v3 = vpack.c.bf16 %v450_v51, %v444_v48  ;;  %v454_v4 = vld [vmem:[#allocation5 + $0x258] sm:$0xff]  ;;  %v2173_v13 = vpack.c.bf16 %v449_v61, %v443_v60  ;;  %v484_v48 = vld [vmem:[#allocation5 + $0x348] sm:$0xff]  ;;  %v2181_v60 = vpack.c.bf16 %v473_v39, %v467_v38  ;;  %v477_v61 = vld [vmem:[#allocation5 + $0x310] sm:$0xff] }
  0xd1   : > { %679 = vmatprep.mubr.f32.mxu0 %v2870_v9  ;;  %775 = vmatprep.mubr.f32.mxu1 %v2873_v10  ;;  %v2111_v22 = vpack.c.bf16 %v460_v5, %v454_v4  ;;  %v480_v51 = vld [vmem:[#allocation5 + $0x328] sm:$0xff]  ;;  %v485_v4 = vld [vmem:[#allocation5 + $0x350] sm:$0xff]  ;;  %v2119_v7 = vpack.c.bf16 %v484_v48, %v478_v47  ;;  %v502_v39 = vld [vmem:[#allocation5 + $0x3d8] sm:$0xff] }
  0xd2   : > { %2096 = vmatprep.subr.bf16.mxu1 %v2095_v11  ;;  %2160 = vmatprep.subr.bf16.mxu0 %v2159_v12  ;;  %v2929_v11 = vld [vmem:[%s2832_s9 + $0x150] sm:$0xff]  ;;  %v2109_v12 = vpack.c.bf16 %v447_v59, %v441_v56  ;;  %v2966_v5 = vld [vmem:[%s2832_s9 + $0x88] sm:$0xff]  ;;  %v510_v47 = vld [vmem:[#allocation5 + $0x418] sm:$0xff] }
  0xd3   : > { %680 = vmatmul.mubr.f32.gmra.mrb[4].mxu0 %v2878_v17  ;;  %776 = vmatmul.mubr.f32.gmra.mrb[4].mxu1 %v2881_v18  ;;  %v2961_v56 = vld [vmem:[%s2832_s9 + $0x170] sm:$0xff] }
  0xd4   : > { %2098 = vmatpush1.bf16.msra.mxu1 %v2097_v19  ;;  %2162 = vmatpush1.bf16.msra.mxu0 %v2161_v20  ;;  %v461_v19 = vld [vmem:[#allocation5 + $0x290] sm:$0xff]  ;;  %v2934_v20 = vld [vmem:[%s2832_s9 + $0x68] sm:$0xff]  ;;  %3808 = vst [vmem:[#allocation27_spill] sm:$0xff] %v2961_v56 }
  0xd5   : > { %685 = vmatprep.mubr.f32.mxu0 %v2886_v25  ;;  %781 = vmatprep.mubr.f32.mxu1 %v2889_v26  ;;  %v2990_v48 = vld [vmem:[%s2832_s9 + $0x90] sm:$0xff] }
  0xd6   : > { %2100 = vmatprep.subr.bf16.mxu1 %v2099_v27  ;;  %2164 = vmatprep.subr.bf16.mxu0 %v2163_v28  ;;  %v472_v27 = vld [vmem:[#allocation5 + $0x2e8] sm:$0xff] }
  0xd7   : > { %686 = vmatmul.mubr.f32.gmra.mrb[6].mxu0 %v2894_v33  ;;  %782 = vmatmul.mubr.f32.gmra.mrb[6].mxu1 %v2897_v34  ;;  %v468_v28 = vld [vmem:[#allocation5 + $0x2c8] sm:$0xff] }
  0xd8   : > { %2102 = vmatpush1.bf16.msra.mxu1 %v2101_v35  ;;  %2166 = vmatpush1.bf16.msra.mxu0 %v2165_v36  ;;  %v2177_v35 = vpack.c.bf16 %v461_v19, %v455_v16  ;;  %v465_v36 = vld [vmem:[#allocation5 + $0x2b0] sm:$0xff]  ;;  %v2179_v46 = vpack.c.bf16 %v474_v29, %v468_v28  ;;  %v498_v16 = vld [vmem:[#allocation5 + $0x3b8] sm:$0xff]  ;;  %v2974_v19 = vld [vmem:[%s2832_s9 + $0x80] sm:$0xff] }
  0xd9   : > { %691 = vmatprep.mubr.f32.mxu0 %v2902_v42  ;;  %787 = vmatprep.mubr.f32.mxu1 %v2905_v43  ;;  %v2117_v59 = vpack.c.bf16 %v471_v37, %v465_v36  ;;  %v495_v28 = vld [vmem:[#allocation5 + $0x3a0] sm:$0xff]  ;;  %v2985_v36 = vld [vmem:[%s2832_s9 + $0x198] sm:$0xff]  ;;  %v2187_v38 = vpack.c.bf16 %v498_v16, %v492_v15  ;;  %v520_v15 = vld [vmem:[#allocation5 + $0x468] sm:$0xff] }
  0xda   : > { %2104 = vmatprep.subr.bf16.mxu1 %v2103_v44  ;;  %2168 = vmatprep.subr.bf16.mxu0 %v2167_v45  ;;  %v2953_v44 = vld [vmem:[%s2832_s9 + $0x178] sm:$0xff]  ;;  %v2115_v45 = vpack.c.bf16 %v472_v27, %v466_v24  ;;  %v489_v27 = vld [vmem:[#allocation5 + $0x370] sm:$0xff]  ;;  %v491_v29 = vld [vmem:[#allocation5 + $0x380] sm:$0xff]  ;;  %3811 = vst [vmem:[#allocation30_spill] sm:$0xff] %v2985_v36 }
  0xdb   : > { %692 = vmatmul.mubr.f32.gmra.mrb[8].mxu0 %v2910_v52  ;;  %788 = vmatmul.mubr.f32.gmra.mrb[8].mxu1 %v2913_v53  ;;  %3807 = vst [vmem:[#allocation26_spill] sm:$0xff] %v2953_v44  ;;  %v516_v16 = vld [vmem:[#allocation5 + $0x448] sm:$0xff] }
  0xdc   : > { %2106 = vmatpush1.bf16.msra.mxu1 %v2105_v54  ;;  %2170 = vmatpush1.bf16.msra.mxu0 %v2169_v55  ;;  %v486_v54 = vld [vmem:[#allocation5 + $0x358] sm:$0xff]  ;;  %v2958_v55 = vld [vmem:[%s2832_s9 + $0x70] sm:$0xff] }
  0xdd   : > { %697 = vmatprep.mubr.f32.mxu0 %v2918_v62  ;;  %793 = vmatprep.mubr.f32.mxu1 %v2921_v63 }
  0xde   : > { %2108 = vmatprep.subr.bf16.mxu1 %v2107_v0  ;;  %2172 = vmatprep.subr.bf16.mxu0 %v2171_v3  ;;  %v483_v0 = vld [vmem:[#allocation5 + $0x340] sm:$0xff] }
  0xdf   : > { %698 = vmatmul.mubr.f32.gmra.mrb[10].mxu0 %v2926_v8  ;;  %794 = vmatmul.mubr.f32.gmra.mrb[10].mxu1 %v2929_v11  ;;  %v479_v3 = vld [vmem:[#allocation5 + $0x320] sm:$0xff] }
  0xe0   : > { %2110 = vmatpush1.bf16.msra.mxu1 %v2109_v12  ;;  %2174 = vmatpush1.bf16.msra.mxu0 %v2173_v13  ;;  %v2183_v12 = vpack.c.bf16 %v486_v54, %v480_v51  ;;  %v490_v13 = vld [vmem:[#allocation5 + $0x378] sm:$0xff]  ;;  %v2185_v24 = vpack.c.bf16 %v485_v4, %v479_v3  ;;  %v2993_v51 = vld [vmem:[%s2832_s9 + $0x190] sm:$0xff]  ;;  %v2125_v54 = vpack.c.bf16 %v495_v28, %v489_v27  ;;  %v2998_v4 = vld [vmem:[%s2832_s9 + $0xa8] sm:$0xff] }
  0xe1   : > { %703 = vmatprep.mubr.f32.mxu0 %v2934_v20  ;;  %799 = vmatprep.mubr.f32.mxu1 %v2937_v21  ;;  %v2123_v37 = vpack.c.bf16 %v496_v14, %v490_v13  ;;  %3812 = vst [vmem:[#allocation31_spill] sm:$0xff] %v2993_v51  ;;  %v509_v3 = vld [vmem:[#allocation5 + $0x410] sm:$0xff]  ;;  %v514_v14 = vld [vmem:[#allocation5 + $0x438] sm:$0xff]  ;;  %v3009_v27 = vld [vmem:[%s2832_s9 + $0x1a0] sm:$0xff] }
  0xe2   : > { %2112 = vmatprep.subr.bf16.mxu1 %v2111_v22  ;;  %2176 = vmatprep.subr.bf16.mxu0 %v2175_v23  ;;  %v2977_v22 = vld [vmem:[%s2832_s9 + $0x180] sm:$0xff]  ;;  %v2121_v23 = vpack.c.bf16 %v483_v0, %v477_v61  ;;  %3814 = vst [vmem:[#allocation33_spill] sm:$0xff] %v3009_v27 }
  0xe3   : > { %704 = vmatmul.mubr.f32.gmra.mrb[12].mxu0 %v2942_v30  ;;  %800 = vmatmul.mubr.f32.gmra.mrb[12].mxu1 %v2945_v31  ;;  %3810 = vst [vmem:[#allocation29_spill] sm:$0xff] %v2977_v22  ;;  %v507_v61 = vld [vmem:[#allocation5 + $0x400] sm:$0xff] }
  0xe4   : > { %2114 = vmatpush1.bf16.msra.mxu1 %v2113_v32  ;;  %2178 = vmatpush1.bf16.msra.mxu0 %v2177_v35  ;;  %v497_v32 = vld [vmem:[#allocation5 + $0x3b0] sm:$0xff]  ;;  %v2982_v35 = vld [vmem:[%s2832_s9 + $0x98] sm:$0xff]  ;;  %v503_v0 = vld [vmem:[#allocation5 + $0x3e0] sm:$0xff] }
  0xe5   : > { %709 = vmatprep.mubr.f32.mxu0 %v2950_v40  ;;  %805 = vmatprep.mubr.f32.mxu1 %v2953_v44 }
  0xe6   : > { %2116 = vmatprep.subr.bf16.mxu1 %v2115_v45  ;;  %2180 = vmatprep.subr.bf16.mxu0 %v2179_v46  ;;  %v508_v45 = vld [vmem:[#allocation5 + $0x408] sm:$0xff] }
  0xe7   : > { %710 = vmatmul.mubr.f32.gmra.mrb[14].mxu0 %v2958_v55  ;;  %806 = vmatmul.mubr.f32.gmra.mrb[14].mxu1 %v2961_v56  ;;  %v504_v46 = vld [vmem:[#allocation5 + $0x3e8] sm:$0xff] }
  0xe8   : > { %2118 = vmatpush1.bf16.msra.mxu1 %v2117_v59  ;;  %2182 = vmatpush1.bf16.msra.mxu0 %v2181_v60  ;;  %v2189_v59 = vpack.c.bf16 %v497_v32, %v491_v29  ;;  %v501_v60 = vld [vmem:[#allocation5 + $0x3d0] sm:$0xff]  ;;  %v2191_v13 = vpack.c.bf16 %v510_v47, %v504_v46  ;;  %v2193_v29 = vpack.c.bf16 %v509_v3, %v503_v0  ;;  %v3017_v46 = vld [vmem:[%s2832_s9 + $0x1b8] sm:$0xff] }
  0xe9   : > { %715 = vmatprep.mubr.f32.mxu0 %v2966_v5  ;;  %811 = vmatprep.mubr.f32.mxu1 %v2969_v6  ;;  %v2129_v28 = vpack.c.bf16 %v507_v61, %v501_v60  ;;  %v513_v32 = vld [vmem:[#allocation5 + $0x430] sm:$0xff]  ;;  %3815 = vst [vmem:[#allocation34_spill] sm:$0xff] %v3017_v46  ;;  %v2131_v47 = vpack.c.bf16 %v520_v15, %v514_v14  ;;  %v532_v60 = vld [vmem:[#allocation5 + $0x4c8] sm:$0xff]  ;;  %v534_v0 = vld [vmem:[#allocation5 + $0x4d8] sm:$0xff] }
  0xea   : > { %2120 = vmatprep.subr.bf16.mxu1 %v2119_v7  ;;  %2184 = vmatprep.subr.bf16.mxu0 %v2183_v12  ;;  %v3001_v7 = vld [vmem:[%s2832_s9 + $0x1a8] sm:$0xff]  ;;  %v2127_v12 = vpack.c.bf16 %v508_v45, %v502_v39  ;;  %v521_v39 = vld [vmem:[#allocation5 + $0x470] sm:$0xff]  ;;  %v3014_v45 = vld [vmem:[%s2832_s9 + $0xb8] sm:$0xff] }
  0xeb   : > { %716 = vmatmul.mubr.f32.gmra.mrb[16].mxu0 %v2974_v19  ;;  %812 = vmatmul.mubr.f32.gmra.mrb[16].mxu1 %v2977_v22  ;;  %3813 = vst [vmem:[#allocation32_spill] sm:$0xff] %v3001_v7  ;;  %v528_v61 = vld [vmem:[#allocation5 + $0x4a8] sm:$0xff]  ;;  %v3022_v3 = vld [vmem:[%s2832_s9 + $0xb0] sm:$0xff]  ;;  %v531_v15 = vld [vmem:[#allocation5 + $0x4c0] sm:$0xff] }
  0xec   : > { %2122 = vmatpush1.bf16.msra.mxu1 %v2121_v23  ;;  %2186 = vmatpush1.bf16.msra.mxu0 %v2185_v24  ;;  %v522_v23 = vld [vmem:[#allocation5 + $0x478] sm:$0xff]  ;;  %v3006_v24 = vld [vmem:[%s2832_s9 + $0xa0] sm:$0xff]  ;;  %v525_v14 = vld [vmem:[#allocation5 + $0x490] sm:$0xff] }
  0xed   : > { %721 = vmatprep.mubr.f32.mxu0 %v2982_v35  ;;  %817 = vmatprep.mubr.f32.mxu1 %v2985_v36 }
  0xee   : > { %2124 = vmatprep.subr.bf16.mxu1 %v2123_v37  ;;  %2188 = vmatprep.subr.bf16.mxu0 %v2187_v38  ;;  %v519_v37 = vld [vmem:[#allocation5 + $0x460] sm:$0xff] }
  0xef   : > { %722 = vmatmul.mubr.f32.gmra.mrb[18].mxu0 %v2990_v48  ;;  %818 = vmatmul.mubr.f32.gmra.mrb[18].mxu1 %v2993_v51  ;;  %v515_v38 = vld [vmem:[#allocation5 + $0x440] sm:$0xff]  ;;  %v2199_v51 = vpack.c.bf16 %v534_v0, %v528_v61  ;;  %v545_v0 = vld [vmem:[#allocation5 + $0x530] sm:$0xff] }
  0xf0   : > { %2126 = vmatpush1.bf16.msra.mxu1 %v2125_v54  ;;  %2190 = vmatpush1.bf16.msra.mxu0 %v2189_v59  ;;  %v2195_v54 = vpack.c.bf16 %v522_v23, %v516_v16  ;;  %v526_v59 = vld [vmem:[#allocation5 + $0x498] sm:$0xff]  ;;  %v527_v16 = vld [vmem:[#allocation5 + $0x4a0] sm:$0xff]  ;;  %v533_v23 = vld [vmem:[#allocation5 + $0x4d0] sm:$0xff] }
  0xf1   : > { %727 = vmatprep.mubr.f32.mxu0 %v2998_v4  ;;  %823 = vmatprep.mubr.f32.mxu1 %v3001_v7  ;;  %v2197_v7 = vpack.c.bf16 %v521_v39, %v515_v38  ;;  %v540_v38 = vld [vmem:[#allocation5 + $0x508] sm:$0xff]  ;;  %v546_v39 = vld [vmem:[#allocation5 + $0x538] sm:$0xff]  ;;  %v2201_v36 = vpack.c.bf16 %v533_v23, %v527_v16  ;;  %v539_v61 = vld [vmem:[#allocation5 + $0x500] sm:$0xff] }
  0xf2   : > { %2128 = vmatprep.subr.bf16.mxu1 %v2127_v12  ;;  %2192 = vmatprep.subr.bf16.mxu0 %v2191_v13  ;;  %v3025_v12 = vld [vmem:[%s2832_s9 + $0x1b0] sm:$0xff]  ;;  %v2133_v13 = vpack.c.bf16 %v519_v37, %v513_v32  ;;  %v538_v32 = vld [vmem:[#allocation5 + $0x4f8] sm:$0xff]  ;;  %v544_v37 = vld [vmem:[#allocation5 + $0x528] sm:$0xff]  ;;  %v2203_v22 = vpack.c.bf16 %v546_v39, %v540_v38  ;;  %v2205_v6 = vpack.c.bf16 %v545_v0, %v539_v61 }
  0xf3   : > { %728 = vmatmul.mubr.f32.gmra.mrb[20].mxu0 %v3006_v24  ;;  %824 = vmatmul.mubr.f32.gmra.mrb[20].mxu1 %v3009_v27  ;;  %3816 = vst [vmem:[#allocation35_spill] sm:$0xff] %v3025_v12  ;;  %v2135_v27 = vpack.c.bf16 %v532_v60, %v526_v59  ;;  %v537_v59 = vld [vmem:[#allocation5 + $0x4f0] sm:$0xff]  ;;  %v543_v60 = vld [vmem:[#allocation5 + $0x520] sm:$0xff]  ;;  %v552_v16 = vld [vmem:[#allocation5 + $0x568] sm:$0xff] }
  0xf4   : > { %2130 = vmatpush1.bf16.msra.mxu1 %v2129_v28  ;;  %2194 = vmatpush1.bf16.msra.mxu0 %v2193_v29  ;;  %v3030_v28 = vld [vmem:[%s2832_s9 + $0xc8] sm:$0xff]  ;;  %v558_v23 = vld [vmem:[#allocation5 + $0x598] sm:$0xff]  ;;  %v551_v38 = vld [vmem:[#allocation5 + $0x560] sm:$0xff] }
  0xf5   : > { %733 = vmatprep.mubr.f32.mxu0 %v3014_v45  ;;  %829 = vmatprep.mubr.f32.mxu1 %v3017_v46  ;;  %v3033_v29 = vld [vmem:[%s2832_s9 + $0x1c8] sm:$0xff]  ;;  %v2137_v46 = vpack.c.bf16 %v531_v15, %v525_v14  ;;  %v550_v14 = vld [vmem:[#allocation5 + $0x558] sm:$0xff]  ;;  %v557_v39 = vld [vmem:[#allocation5 + $0x590] sm:$0xff]  ;;  %v2207_v56 = vpack.c.bf16 %v558_v23, %v552_v16 }
  0xf6   : > { %2132 = vmatprep.subr.bf16.mxu1 %v2131_v47  ;;  %2196 = vmatprep.subr.bf16.mxu0 %v2195_v54  ;;  %3817 = vst [vmem:[#allocation36_spill] sm:$0xff] %v3033_v29  ;;  %v3038_v47 = vld [vmem:[%s2832_s9 + $0xc0] sm:$0xff]  ;;  %v556_v15 = vld [vmem:[#allocation5 + $0x588] sm:$0xff]  ;;  %v570_v0 = vld [vmem:[#allocation5 + $0x5f8] sm:$0xff]  ;;  %v2209_v44 = vpack.c.bf16 %v557_v39, %v551_v38 }
  0xf7   : > { %734 = vmatmul.mubr.f32.gmra.mrb[22].mxu0 %v3022_v3  ;;  %830 = vmatmul.mubr.f32.gmra.mrb[22].mxu1 %v3025_v12  ;;  %v3041_v54 = vld [vmem:[%s2832_s9 + $0x1c0] sm:$0xff]  ;;  %v2139_v12 = vpack.c.bf16 %v544_v37, %v538_v32  ;;  %v549_v32 = vld [vmem:[#allocation5 + $0x550] sm:$0xff]  ;;  %v564_v61 = vld [vmem:[#allocation5 + $0x5c8] sm:$0xff] }
  0xf8   : > { %2134 = vmatpush1.bf16.msra.mxu1 %v2133_v13  ;;  %2198 = vmatpush1.bf16.msra.mxu0 %v2197_v7  ;;  %3818 = vst [vmem:[#allocation37_spill] sm:$0xff] %v3041_v54  ;;  %v3046_v13 = vld [vmem:[%s2832_s9 + $0xd8] sm:$0xff]  ;;  %v555_v37 = vld [vmem:[#allocation5 + $0x580] sm:$0xff]  ;;  %v569_v23 = vld [vmem:[#allocation5 + $0x5f0] sm:$0xff]  ;;  %v2211_v31 = vpack.c.bf16 %v570_v0, %v564_v61 }
  0xf9   : > { %739 = vmatprep.mubr.f32.mxu0 %v3030_v28  ;;  %835 = vmatprep.mubr.f32.mxu1 %v3033_v29  ;;  %v3049_v7 = vld [vmem:[%s2832_s9 + $0x1d8] sm:$0xff]  ;;  %v2141_v29 = vpack.c.bf16 %v543_v60, %v537_v59  ;;  %v568_v60 = vld [vmem:[#allocation5 + $0x5e8] sm:$0xff]  ;;  %v563_v16 = vld [vmem:[#allocation5 + $0x5c0] sm:$0xff] }
  0xfa   : > { %2136 = vmatprep.subr.bf16.mxu1 %v2135_v27  ;;  %2200 = vmatprep.subr.bf16.mxu0 %v2199_v51  ;;  %3819 = vst [vmem:[#allocation38_spill] sm:$0xff] %v3049_v7  ;;  %v3054_v27 = vld [vmem:[%s2832_s9 + $0xd0] sm:$0xff]  ;;  %v562_v59 = vld [vmem:[#allocation5 + $0x5b8] sm:$0xff]  ;;  %v2213_v39 = vpack.c.bf16 %v569_v23, %v563_v16 }
  0xfb   : > { %740 = vmatmul.mubr.f32.gmra.mrb[24].mxu0 %v3038_v47  ;;  %836 = vmatmul.mubr.f32.gmra.mrb[24].mxu1 %v3041_v54  ;;  %v3057_v51 = vld [vmem:[%s2832_s9 + $0x1d0] sm:$0xff]  ;;  %v2143_v54 = vpack.c.bf16 %v556_v15, %v550_v14  ;;  %v567_v15 = vld [vmem:[#allocation5 + $0x5e0] sm:$0xff] }
  0xfc   : > { %2138 = vmatpush1.bf16.msra.mxu1 %v2137_v46  ;;  %2202 = vmatpush1.bf16.msra.mxu0 %v2201_v36  ;;  %3820 = vst [vmem:[#allocation39_spill] sm:$0xff] %v3057_v51  ;;  %v3062_v46 = vld [vmem:[%s2832_s9 + $0xe8] sm:$0xff]  ;;  %v561_v14 = vld [vmem:[#allocation5 + $0x5b0] sm:$0xff] }
  0xfd   : > { %745 = vmatprep.mubr.f32.mxu0 %v3046_v13  ;;  %841 = vmatprep.mubr.f32.mxu1 %v3049_v7  ;;  %v3065_v36 = vld [vmem:[%s2832_s9 + $0x1e8] sm:$0xff]  ;;  %v2145_v7 = vpack.c.bf16 %v555_v37, %v549_v32  ;;  %v3086_v32 = vld [vmem:[%s2832_s9 + $0xf0] sm:$0xff]  ;;  %v2149_v38 = vpack.c.bf16 %v567_v15, %v561_v14 }
  0xfe   : > { %2140 = vmatprep.subr.bf16.mxu1 %v2139_v12  ;;  %2204 = vmatprep.subr.bf16.mxu0 %v2203_v22  ;;  %v3070_v12 = vld [vmem:[%s2832_s9 + $0xe0] sm:$0xff]  ;;  %v3089_v37 = vld [vmem:[%s2832_s9 + $0x1f0] sm:$0xff] }
  0xff   : > { %746 = vmatmul.mubr.f32.gmra.mrb[26].mxu0 %v3054_v27  ;;  %842 = vmatmul.mubr.f32.gmra.mrb[26].mxu1 %v3057_v51  ;;  %v3073_v22 = vld [vmem:[%s2832_s9 + $0x1e0] sm:$0xff]  ;;  %v2147_v51 = vpack.c.bf16 %v568_v60, %v562_v59 }
 0x100   : > { %2142 = vmatpush1.bf16.msra.mxu1 %v2141_v29  ;;  %2206 = vmatpush1.bf16.msra.mxu0 %v2205_v6  ;;  %v3078_v29 = vld [vmem:[%s2832_s9 + $0xf8] sm:$0xff] }
 0x101   : > { %751 = vmatprep.mubr.f32.mxu0 %v3062_v46  ;;  %847 = vmatprep.mubr.f32.mxu1 %v3065_v36  ;;  %v3081_v6 = vld [vmem:[%s2832_s9 + $0x1f8] sm:$0xff] }
 0x102   : > { %2144 = vmatprep.subr.bf16.mxu1 %v2143_v54  ;;  %2208 = vmatprep.subr.bf16.mxu0 %v2207_v56 }
 0x103   : > { %752 = vmatmul.mubr.f32.gmra.mrb[28].mxu0 %v3070_v12  ;;  %848 = vmatmul.mubr.f32.gmra.mrb[28].mxu1 %v3073_v22 }
 0x104   : > { %2146 = vmatpush1.bf16.msra.mxu1 %v2145_v7  ;;  %2210 = vmatpush1.bf16.msra.mxu0 %v2209_v44 }
 0x105   : > { %757 = vmatprep.mubr.f32.mxu0 %v3078_v29  ;;  %853 = vmatprep.mubr.f32.mxu1 %v3081_v6 }
 0x106   : > { %2148 = vmatprep.subr.bf16.mxu1 %v2147_v51  ;;  %2212 = vmatprep.subr.bf16.mxu0 %v2211_v31 }
 0x107   : > { %758 = vmatmul.mubr.f32.gmra.mrb[30].mxu0 %v3086_v32  ;;  %854 = vmatmul.mubr.f32.gmra.mrb[30].mxu1 %v3089_v37 }
 0x108   : > { %2150 = vmatpush1.bf16.msra.mxu1 %v2149_v38  ;;  %2214 = vmatpush1.bf16.msra.mxu0 %v2213_v39 }
 0x109   : > { %924 = vmatprep.mubr.f32.mxu1 %v2843_v41  ;;  %1181 = vmatprep.mubr.f32.mxu0 %v2843_v41  ;;  %v2399_v41 = vld [vmem:[%s2832_s9 + $0x108] sm:$0xff] }
 0x10b   : > { %925 = vmatmul.mubr.f32.vlgmr.msra.gmra.mrb[32].mxu1 %v2848_v49  ;;  %1182 = vmatmul.mubr.f32.vlgmr.msra.gmra.mrb[32].mxu0 %v2848_v49  ;;  %v3821_v49 = vld [vmem:[#allocation25_spill] sm:$0xff] }
 0x10c   : > { %930 = vmatprep.mubr.f32.mxu1 %v2854_v57  ;;  %1187 = vmatprep.mubr.f32.mxu0 %v2854_v57  ;;  %v3823_v57 = vld [vmem:[#allocation27_spill] sm:$0xff] }
 0x10f   : > { %931 = vmatmul.mubr.f32.gmra.mrb[34].mxu1 %v2862_v1  ;;  %1188 = vmatmul.mubr.f32.gmra.mrb[34].mxu0 %v2862_v1  ;;  %v3825_v1 = vld [vmem:[#allocation29_spill] sm:$0xff] }
 0x110   : > { %936 = vmatprep.mubr.f32.mxu1 %v2870_v9  ;;  %1193 = vmatprep.mubr.f32.mxu0 %v2870_v9  ;;  %v3827_v9 = vld [vmem:[#allocation31_spill] sm:$0xff] }
 0x113   : > { %937 = vmatmul.mubr.f32.gmra.mrb[36].mxu1 %v2878_v17  ;;  %1194 = vmatmul.mubr.f32.gmra.mrb[36].mxu0 %v2878_v17  ;;  %v3829_v17 = vld [vmem:[#allocation33_spill] sm:$0xff] }
 0x114   : > { %942 = vmatprep.mubr.f32.mxu1 %v2886_v25  ;;  %1199 = vmatprep.mubr.f32.mxu0 %v2886_v25  ;;  %v3831_v25 = vld [vmem:[#allocation35_spill] sm:$0xff] }
 0x117   : > { %943 = vmatmul.mubr.f32.gmra.mrb[38].mxu1 %v2894_v33  ;;  %1200 = vmatmul.mubr.f32.gmra.mrb[38].mxu0 %v2894_v33  ;;  %v3833_v33 = vld [vmem:[#allocation37_spill] sm:$0xff] }
 0x118   : > { %948 = vmatprep.mubr.f32.mxu1 %v2902_v42  ;;  %1205 = vmatprep.mubr.f32.mxu0 %v2902_v42  ;;  %v3835_v42 = vld [vmem:[#allocation39_spill] sm:$0xff] }
 0x11b   : > { %949 = vmatmul.mubr.f32.gmra.mrb[40].mxu1 %v2910_v52  ;;  %1206 = vmatmul.mubr.f32.gmra.mrb[40].mxu0 %v2910_v52 }
 0x11c   : > { %954 = vmatprep.mubr.f32.mxu1 %v2918_v62  ;;  %1211 = vmatprep.mubr.f32.mxu0 %v2918_v62  ;;  %v3225_v62 = vld [vmem:[#allocation7] sm:$0x3f] }
 0x11f   : > { %955 = vmatmul.mubr.f32.gmra.mrb[42].mxu1 %v2926_v8  ;;  %1212 = vmatmul.mubr.f32.gmra.mrb[42].mxu0 %v2926_v8 }
 0x120   : > { %960 = vmatprep.mubr.f32.mxu1 %v2934_v20  ;;  %1217 = vmatprep.mubr.f32.mxu0 %v2934_v20 }
 0x123   : > { %961 = vmatmul.mubr.f32.gmra.mrb[44].mxu1 %v2942_v30  ;;  %1218 = vmatmul.mubr.f32.gmra.mrb[44].mxu0 %v2942_v30 }
 0x124   : > { %966 = vmatprep.mubr.f32.mxu1 %v2950_v40  ;;  %1223 = vmatprep.mubr.f32.mxu0 %v2950_v40 }
 0x127   : > { %967 = vmatmul.mubr.f32.gmra.mrb[46].mxu1 %v2958_v55  ;;  %1224 = vmatmul.mubr.f32.gmra.mrb[46].mxu0 %v2958_v55 }
 0x128   : > { %972 = vmatprep.mubr.f32.mxu1 %v2966_v5  ;;  %1229 = vmatprep.mubr.f32.mxu0 %v2966_v5 }
 0x12b   : > { %973 = vmatmul.mubr.f32.gmra.mrb[48].mxu1 %v2974_v19  ;;  %1230 = vmatmul.mubr.f32.gmra.mrb[48].mxu0 %v2974_v19 }
 0x12c   : > { %978 = vmatprep.mubr.f32.mxu1 %v2982_v35  ;;  %1235 = vmatprep.mubr.f32.mxu0 %v2982_v35 }
 0x12f   : > { %979 = vmatmul.mubr.f32.gmra.mrb[50].mxu1 %v2990_v48  ;;  %1236 = vmatmul.mubr.f32.gmra.mrb[50].mxu0 %v2990_v48 }
 0x130   : > { %984 = vmatprep.mubr.f32.mxu1 %v2998_v4  ;;  %1241 = vmatprep.mubr.f32.mxu0 %v2998_v4 }
 0x133   : > { %985 = vmatmul.mubr.f32.gmra.mrb[52].mxu1 %v3006_v24  ;;  %1242 = vmatmul.mubr.f32.gmra.mrb[52].mxu0 %v3006_v24 }
 0x134   : > { %990 = vmatprep.mubr.f32.mxu1 %v3014_v45  ;;  %1247 = vmatprep.mubr.f32.mxu0 %v3014_v45 }
 0x137   : > { %991 = vmatmul.mubr.f32.gmra.mrb[54].mxu1 %v3022_v3  ;;  %1248 = vmatmul.mubr.f32.gmra.mrb[54].mxu0 %v3022_v3 }
 0x138   : > { %996 = vmatprep.mubr.f32.mxu1 %v3030_v28  ;;  %1253 = vmatprep.mubr.f32.mxu0 %v3030_v28 }
 0x13b   : > { %997 = vmatmul.mubr.f32.gmra.mrb[56].mxu1 %v3038_v47  ;;  %1254 = vmatmul.mubr.f32.gmra.mrb[56].mxu0 %v3038_v47 }
 0x13c   : > { %1002 = vmatprep.mubr.f32.mxu1 %v3046_v13  ;;  %1259 = vmatprep.mubr.f32.mxu0 %v3046_v13 }
 0x13f   : > { %1003 = vmatmul.mubr.f32.gmra.mrb[58].mxu1 %v3054_v27  ;;  %1260 = vmatmul.mubr.f32.gmra.mrb[58].mxu0 %v3054_v27 }
 0x140   : > { %1008 = vmatprep.mubr.f32.mxu1 %v3062_v46  ;;  %1265 = vmatprep.mubr.f32.mxu0 %v3062_v46 }
 0x143   : > { %1009 = vmatmul.mubr.f32.gmra.mrb[60].mxu1 %v3070_v12  ;;  %1266 = vmatmul.mubr.f32.gmra.mrb[60].mxu0 %v3070_v12 }
 0x144   : > { %1014 = vmatprep.mubr.f32.mxu1 %v3078_v29  ;;  %1271 = vmatprep.mubr.f32.mxu0 %v3078_v29 }
 0x147   : > { %1015 = vmatmul.mubr.f32.gmra.mrb[62].mxu1 %v3086_v32  ;;  %1272 = vmatmul.mubr.f32.gmra.mrb[62].mxu0 %v3086_v32 }
 0x148   : > { %1020 = vmatprep.mubr.f32.mxu1 %v2399_v41  ;;  %1277 = vmatprep.mubr.f32.mxu0 %v2399_v41 }
 0x14b   : > { %1021 = vmatmul.mubr.f32.gmra.mrb[64].mxu1 %v2851_v50  ;;  %1278 = vmatmul.mubr.f32.gmra.mrb[64].mxu0 %v2851_v50  ;;  %v3822_v50 = vld [vmem:[#allocation26_spill] sm:$0xff] }
 0x14c   : > { %1026 = vmatprep.mubr.f32.mxu1 %v2857_v58  ;;  %1283 = vmatprep.mubr.f32.mxu0 %v2857_v58  ;;  %v3824_v58 = vld [vmem:[#allocation28_spill] sm:$0xff] }
 0x14f   : > { %1027 = vmatmul.mubr.f32.gmra.mrb[66].mxu1 %v2865_v2  ;;  %1284 = vmatmul.mubr.f32.gmra.mrb[66].mxu0 %v2865_v2  ;;  %v3826_v2 = vld [vmem:[#allocation30_spill] sm:$0xff] }
 0x150   : > { %1032 = vmatprep.mubr.f32.mxu1 %v2873_v10  ;;  %1289 = vmatprep.mubr.f32.mxu0 %v2873_v10  ;;  %v3828_v10 = vld [vmem:[#allocation32_spill] sm:$0xff] }
 0x153   : > { %1033 = vmatmul.mubr.f32.gmra.mrb[68].mxu1 %v2881_v18  ;;  %1290 = vmatmul.mubr.f32.gmra.mrb[68].mxu0 %v2881_v18  ;;  %v3830_v18 = vld [vmem:[#allocation34_spill] sm:$0xff] }
 0x154   : > { %1038 = vmatprep.mubr.f32.mxu1 %v2889_v26  ;;  %1295 = vmatprep.mubr.f32.mxu0 %v2889_v26  ;;  %v3832_v26 = vld [vmem:[#allocation36_spill] sm:$0xff] }
 0x157   : > { %1039 = vmatmul.mubr.f32.gmra.mrb[70].mxu1 %v2897_v34  ;;  %1296 = vmatmul.mubr.f32.gmra.mrb[70].mxu0 %v2897_v34  ;;  %v3834_v34 = vld [vmem:[#allocation38_spill] sm:$0xff] }
 0x158   : > { %1044 = vmatprep.mubr.f32.mxu1 %v2905_v43  ;;  %1301 = vmatprep.mubr.f32.mxu0 %v2905_v43  ;;  %v573_v43 = vlaneseq }
 0x15a   : > { %v3222_v52 = vshrl.u32 %v573_v43, 7 }
 0x15b   : > { %1045 = vmatmul.mubr.f32.gmra.mrb[72].mxu1 %v2913_v53  ;;  %1302 = vmatmul.mubr.f32.gmra.mrb[72].mxu0 %v2913_v53 }
 0x15c   : > { %1050 = vmatprep.mubr.f32.mxu1 %v2921_v63  ;;  %1307 = vmatprep.mubr.f32.mxu0 %v2921_v63  ;;  %v575_v53 = vsub.s32 0, %v3222_v52  ;;  %v579_v63 = vsub.s32 1, %v3222_v52 }
 0x15e   : > { %v3229_v8 = vrot.slane %v3225_v62, %v575_v53 }
 0x15f   : > { %1051 = vmatmul.mubr.f32.gmra.mrb[74].mxu1 %v2929_v11  ;;  %1308 = vmatmul.mubr.f32.gmra.mrb[74].mxu0 %v2929_v11  ;;  %v3232_v11 = vrot.slane %v3225_v62, %v579_v63 }
 0x160   : > { %1056 = vmatprep.mubr.f32.mxu1 %v2937_v21  ;;  %1313 = vmatprep.mubr.f32.mxu0 %v2937_v21 }
 0x163   : > { %1057 = vmatmul.mubr.f32.gmra.mrb[76].mxu1 %v3821_v49  ;;  %1314 = vmatmul.mubr.f32.gmra.mrb[76].mxu0 %v3821_v49 }
 0x164   : > { %1062 = vmatprep.mubr.f32.mxu1 %v3822_v50  ;;  %1319 = vmatprep.mubr.f32.mxu0 %v3822_v50 }
 0x167   : > { %1063 = vmatmul.mubr.f32.gmra.mrb[78].mxu1 %v3823_v57  ;;  %1320 = vmatmul.mubr.f32.gmra.mrb[78].mxu0 %v3823_v57 }
 0x168   : > { %1068 = vmatprep.mubr.f32.mxu1 %v3824_v58  ;;  %1325 = vmatprep.mubr.f32.mxu0 %v3824_v58 }
 0x16b   : > { %1069 = vmatmul.mubr.f32.gmra.mrb[80].mxu1 %v3825_v1  ;;  %1326 = vmatmul.mubr.f32.gmra.mrb[80].mxu0 %v3825_v1 }
 0x16c   : > { %1074 = vmatprep.mubr.f32.mxu1 %v3826_v2  ;;  %1331 = vmatprep.mubr.f32.mxu0 %v3826_v2 }
 0x16f   : > { %1075 = vmatmul.mubr.f32.gmra.mrb[82].mxu1 %v3827_v9  ;;  %1332 = vmatmul.mubr.f32.gmra.mrb[82].mxu0 %v3827_v9 }
 0x170   : > { %1080 = vmatprep.mubr.f32.mxu1 %v3828_v10  ;;  %1337 = vmatprep.mubr.f32.mxu0 %v3828_v10 }
 0x173   : > { %1081 = vmatmul.mubr.f32.gmra.mrb[84].mxu1 %v3829_v17  ;;  %1338 = vmatmul.mubr.f32.gmra.mrb[84].mxu0 %v3829_v17 }
 0x174   : > { %1086 = vmatprep.mubr.f32.mxu1 %v3830_v18  ;;  %1343 = vmatprep.mubr.f32.mxu0 %v3830_v18 }
 0x177   : > { %1087 = vmatmul.mubr.f32.gmra.mrb[86].mxu1 %v3831_v25  ;;  %1344 = vmatmul.mubr.f32.gmra.mrb[86].mxu0 %v3831_v25 }
 0x178   : > { %1092 = vmatprep.mubr.f32.mxu1 %v3832_v26  ;;  %1349 = vmatprep.mubr.f32.mxu0 %v3832_v26 }
 0x17b   : > { %1093 = vmatmul.mubr.f32.gmra.mrb[88].mxu1 %v3833_v33  ;;  %1350 = vmatmul.mubr.f32.gmra.mrb[88].mxu0 %v3833_v33 }
 0x17c   : > { %1098 = vmatprep.mubr.f32.mxu1 %v3834_v34  ;;  %1355 = vmatprep.mubr.f32.mxu0 %v3834_v34 }
 0x17f   : > { %1099 = vmatmul.mubr.f32.gmra.mrb[90].mxu1 %v3835_v42  ;;  %1356 = vmatmul.mubr.f32.gmra.mrb[90].mxu0 %v3835_v42 }
 0x180   : > { %1104 = vmatprep.mubr.f32.mxu1 %v3065_v36  ;;  %1361 = vmatprep.mubr.f32.mxu0 %v3065_v36 }
 0x183   : > { %1105 = vmatmul.mubr.f32.gmra.mrb[92].mxu1 %v3073_v22  ;;  %1362 = vmatmul.mubr.f32.gmra.mrb[92].mxu0 %v3073_v22 }
 0x184   : > { %1110 = vmatprep.mubr.f32.mxu1 %v3081_v6  ;;  %1367 = vmatprep.mubr.f32.mxu0 %v3081_v6 }
 0x187   : > { %1111 = vmatmul.mubr.f32.gmra.mrb[94].mxu1 %v3089_v37  ;;  %1368 = vmatmul.mubr.f32.gmra.mrb[94].mxu0 %v3089_v37 }
 0x19e   : > { %v669_v20 = vpop.f32.mrb[0].mxu0  ;;  %v765_v21 = vpop.f32.mrb[0].mxu1 }
 0x19f   : > { %v670_v30 = vadd.f32 %v669_v20, %v3229_v8  ;;  %v766_v31 = vadd.f32 %v765_v21, %v3229_v8  ;;  %v671_v40 = vpop.f32.mrb[1].mxu0  ;;  %v767_v44 = vpop.f32.mrb[1].mxu1 }
 0x1a0   : > { %v672_v55 = vadd.f32 %v671_v40, %v3232_v11  ;;  %v768_v56 = vadd.f32 %v767_v44, %v3232_v11 }
 0x1a1   : > { %1374 = vst [vmem:[%s3239_s1] sm:$0xff] %v670_v30  ;;  %1390 = vst [vmem:[%s3239_s1 + $0x80] sm:$0xff] %v766_v31 }
 0x1a2   : > { %1912 = vst [vmem:[%s3239_s1 + $0x100] sm:$0xff] %v672_v55  ;;  %1928 = vst [vmem:[%s3239_s1 + $0x180] sm:$0xff] %v768_v56  ;;  %v675_v5 = vpop.f32.mrb[2].mxu0  ;;  %v771_v19 = vpop.f32.mrb[2].mxu1 }
 0x1a3   : > { %v676_v35 = vadd.f32 %v675_v5, %v3229_v8  ;;  %v772_v48 = vadd.f32 %v771_v19, %v3229_v8  ;;  %v677_v4 = vpop.f32.mrb[3].mxu0  ;;  %v773_v24 = vpop.f32.mrb[3].mxu1 }
 0x1a4   : > { %v678_v45 = vadd.f32 %v677_v4, %v3232_v11  ;;  %v774_v3 = vadd.f32 %v773_v24, %v3232_v11 }
 0x1a5   : > { %1375 = vst [vmem:[%s3239_s1 + $0x8] sm:$0xff] %v676_v35  ;;  %1391 = vst [vmem:[%s3239_s1 + $0x88] sm:$0xff] %v772_v48 }
 0x1a6   : > { %1913 = vst [vmem:[%s3239_s1 + $0x108] sm:$0xff] %v678_v45  ;;  %1929 = vst [vmem:[%s3239_s1 + $0x188] sm:$0xff] %v774_v3  ;;  %v681_v28 = vpop.f32.mrb[4].mxu0  ;;  %v777_v47 = vpop.f32.mrb[4].mxu1 }
 0x1a7   : > { %v682_v54 = vadd.f32 %v681_v28, %v3229_v8  ;;  %v778_v13 = vadd.f32 %v777_v47, %v3229_v8  ;;  %v683_v7 = vpop.f32.mrb[5].mxu0  ;;  %v779_v27 = vpop.f32.mrb[5].mxu1 }
 0x1a8   : > { %v684_v51 = vadd.f32 %v683_v7, %v3232_v11  ;;  %v780_v46 = vadd.f32 %v779_v27, %v3232_v11 }
 0x1a9   : > { %1376 = vst [vmem:[%s3239_s1 + $0x10] sm:$0xff] %v682_v54  ;;  %1392 = vst [vmem:[%s3239_s1 + $0x90] sm:$0xff] %v778_v13 }
 0x1aa   : > { %1914 = vst [vmem:[%s3239_s1 + $0x110] sm:$0xff] %v684_v51  ;;  %1930 = vst [vmem:[%s3239_s1 + $0x190] sm:$0xff] %v780_v46  ;;  %v687_v36 = vpop.f32.mrb[6].mxu0  ;;  %v783_v59 = vpop.f32.mrb[6].mxu1 }
 0x1ab   : > { %v688_v60 = vadd.f32 %v687_v36, %v3229_v8  ;;  %v784_v61 = vadd.f32 %v783_v59, %v3229_v8  ;;  %v689_v0 = vpop.f32.mrb[7].mxu0  ;;  %v785_v12 = vpop.f32.mrb[7].mxu1 }
 0x1ac   : > { %v690_v22 = vadd.f32 %v689_v0, %v3232_v11  ;;  %v786_v14 = vadd.f32 %v785_v12, %v3232_v11 }
 0x1ad   : > { %1377 = vst [vmem:[%s3239_s1 + $0x18] sm:$0xff] %v688_v60  ;;  %1393 = vst [vmem:[%s3239_s1 + $0x98] sm:$0xff] %v784_v61 }
 0x1ae   : > { %1915 = vst [vmem:[%s3239_s1 + $0x118] sm:$0xff] %v690_v22  ;;  %1931 = vst [vmem:[%s3239_s1 + $0x198] sm:$0xff] %v786_v14  ;;  %v693_v15 = vpop.f32.mrb[8].mxu0  ;;  %v789_v16 = vpop.f32.mrb[8].mxu1 }
 0x1af   : > { %v694_v23 = vadd.f32 %v693_v15, %v3229_v8  ;;  %v790_v29 = vadd.f32 %v789_v16, %v3229_v8  ;;  %v695_v6 = vpop.f32.mrb[9].mxu0  ;;  %v791_v32 = vpop.f32.mrb[9].mxu1 }
 0x1b0   : > { %v696_v37 = vadd.f32 %v695_v6, %v3232_v11  ;;  %v792_v38 = vadd.f32 %v791_v32, %v3232_v11 }
 0x1b1   : > { %1378 = vst [vmem:[%s3239_s1 + $0x20] sm:$0xff] %v694_v23  ;;  %1394 = vst [vmem:[%s3239_s1 + $0xa0] sm:$0xff] %v790_v29 }
 0x1b2   : > { %1916 = vst [vmem:[%s3239_s1 + $0x120] sm:$0xff] %v696_v37  ;;  %1932 = vst [vmem:[%s3239_s1 + $0x1a0] sm:$0xff] %v792_v38  ;;  %v699_v39 = vpop.f32.mrb[10].mxu0  ;;  %v795_v41 = vpop.f32.mrb[10].mxu1 }
 0x1b3   : > { %v700_v49 = vadd.f32 %v699_v39, %v3229_v8  ;;  %v796_v50 = vadd.f32 %v795_v41, %v3229_v8  ;;  %v701_v57 = vpop.f32.mrb[11].mxu0  ;;  %v797_v58 = vpop.f32.mrb[11].mxu1 }
 0x1b4   : > { %v702_v1 = vadd.f32 %v701_v57, %v3232_v11  ;;  %v798_v2 = vadd.f32 %v797_v58, %v3232_v11 }
 0x1b5   : > { %1379 = vst [vmem:[%s3239_s1 + $0x28] sm:$0xff] %v700_v49  ;;  %1395 = vst [vmem:[%s3239_s1 + $0xa8] sm:$0xff] %v796_v50 }
 0x1b6   : > { %1917 = vst [vmem:[%s3239_s1 + $0x128] sm:$0xff] %v702_v1  ;;  %1933 = vst [vmem:[%s3239_s1 + $0x1a8] sm:$0xff] %v798_v2  ;;  %v705_v9 = vpop.f32.mrb[12].mxu0  ;;  %v801_v10 = vpop.f32.mrb[12].mxu1 }
 0x1b7   : > { %v706_v17 = vadd.f32 %v705_v9, %v3229_v8  ;;  %v802_v18 = vadd.f32 %v801_v10, %v3229_v8  ;;  %v707_v25 = vpop.f32.mrb[13].mxu0  ;;  %v803_v26 = vpop.f32.mrb[13].mxu1 }
 0x1b8   : > { %v708_v33 = vadd.f32 %v707_v25, %v3232_v11  ;;  %v804_v34 = vadd.f32 %v803_v26, %v3232_v11 }
 0x1b9   : > { %1380 = vst [vmem:[%s3239_s1 + $0x30] sm:$0xff] %v706_v17  ;;  %1396 = vst [vmem:[%s3239_s1 + $0xb0] sm:$0xff] %v802_v18 }
 0x1ba   : > { %1918 = vst [vmem:[%s3239_s1 + $0x130] sm:$0xff] %v708_v33  ;;  %1934 = vst [vmem:[%s3239_s1 + $0x1b0] sm:$0xff] %v804_v34  ;;  %v711_v42 = vpop.f32.mrb[14].mxu0  ;;  %v807_v43 = vpop.f32.mrb[14].mxu1 }
 0x1bb   : > { %v712_v53 = vadd.f32 %v711_v42, %v3229_v8  ;;  %v808_v63 = vadd.f32 %v807_v43, %v3229_v8  ;;  %v713_v20 = vpop.f32.mrb[15].mxu0  ;;  %v809_v21 = vpop.f32.mrb[15].mxu1 }
 0x1bc   : > { %v714_v30 = vadd.f32 %v713_v20, %v3232_v11  ;;  %v810_v31 = vadd.f32 %v809_v21, %v3232_v11 }
 0x1bd   : > { %1381 = vst [vmem:[%s3239_s1 + $0x38] sm:$0xff] %v712_v53  ;;  %1397 = vst [vmem:[%s3239_s1 + $0xb8] sm:$0xff] %v808_v63  ;;  %v583_v53 = vsub.s32 2, %v3222_v52  ;;  %v591_v63 = vsub.s32 4, %v3222_v52 }
 0x1be   : > { %1919 = vst [vmem:[%s3239_s1 + $0x138] sm:$0xff] %v714_v30  ;;  %1935 = vst [vmem:[%s3239_s1 + $0x1b8] sm:$0xff] %v810_v31  ;;  %v717_v40 = vpop.f32.mrb[16].mxu0  ;;  %v813_v44 = vpop.f32.mrb[16].mxu1  ;;  %v587_v30 = vsub.s32 3, %v3222_v52  ;;  %v595_v31 = vsub.s32 5, %v3222_v52 }
 0x1bf   : > { %v718_v55 = vadd.f32 %v717_v40, %v3229_v8  ;;  %v814_v56 = vadd.f32 %v813_v44, %v3229_v8  ;;  %v719_v5 = vpop.f32.mrb[17].mxu0  ;;  %v815_v19 = vpop.f32.mrb[17].mxu1  ;;  %v3367_v52 = vrot.slane %v3225_v62, %v591_v63 }
 0x1c0   : > { %v720_v35 = vadd.f32 %v719_v5, %v3232_v11  ;;  %v816_v48 = vadd.f32 %v815_v19, %v3232_v11 }
 0x1c1   : > { %1382 = vst [vmem:[%s3239_s1 + $0x40] sm:$0xff] %v718_v55  ;;  %1398 = vst [vmem:[%s3239_s1 + $0xc0] sm:$0xff] %v814_v56 }
 0x1c2   : > { %1920 = vst [vmem:[%s3239_s1 + $0x140] sm:$0xff] %v720_v35  ;;  %1936 = vst [vmem:[%s3239_s1 + $0x1c0] sm:$0xff] %v816_v48  ;;  %v723_v4 = vpop.f32.mrb[18].mxu0  ;;  %v819_v24 = vpop.f32.mrb[18].mxu1  ;;  %v3364_v35 = vrot.slane %v3225_v62, %v583_v53 }
 0x1c3   : > { %v724_v45 = vadd.f32 %v723_v4, %v3229_v8  ;;  %v820_v3 = vadd.f32 %v819_v24, %v3229_v8  ;;  %v725_v28 = vpop.f32.mrb[19].mxu0  ;;  %v821_v47 = vpop.f32.mrb[19].mxu1  ;;  %v3372_v24 = vrot.slane %v3225_v62, %v587_v30 }
 0x1c4   : > { %v726_v54 = vadd.f32 %v725_v28, %v3232_v11  ;;  %v822_v13 = vadd.f32 %v821_v47, %v3232_v11 }
 0x1c5   : > { %1383 = vst [vmem:[%s3239_s1 + $0x48] sm:$0xff] %v724_v45  ;;  %1399 = vst [vmem:[%s3239_s1 + $0xc8] sm:$0xff] %v820_v3  ;;  %v3375_v45 = vrot.slane %v3225_v62, %v595_v31 }
 0x1c6   : > { %1921 = vst [vmem:[%s3239_s1 + $0x148] sm:$0xff] %v726_v54  ;;  %1937 = vst [vmem:[%s3239_s1 + $0x1c8] sm:$0xff] %v822_v13  ;;  %v729_v7 = vpop.f32.mrb[20].mxu0  ;;  %v825_v27 = vpop.f32.mrb[20].mxu1 }
 0x1c7   : > { %v730_v51 = vadd.f32 %v729_v7, %v3229_v8  ;;  %v826_v46 = vadd.f32 %v825_v27, %v3229_v8  ;;  %v731_v36 = vpop.f32.mrb[21].mxu0  ;;  %v827_v59 = vpop.f32.mrb[21].mxu1 }
 0x1c8   : > { %v732_v60 = vadd.f32 %v731_v36, %v3232_v11  ;;  %v828_v61 = vadd.f32 %v827_v59, %v3232_v11 }
 0x1c9   : > { %1384 = vst [vmem:[%s3239_s1 + $0x50] sm:$0xff] %v730_v51  ;;  %1400 = vst [vmem:[%s3239_s1 + $0xd0] sm:$0xff] %v826_v46 }
 0x1ca   : > { %1922 = vst [vmem:[%s3239_s1 + $0x150] sm:$0xff] %v732_v60  ;;  %1938 = vst [vmem:[%s3239_s1 + $0x1d0] sm:$0xff] %v828_v61  ;;  %v735_v0 = vpop.f32.mrb[22].mxu0  ;;  %v831_v12 = vpop.f32.mrb[22].mxu1 }
 0x1cb   : > { %v736_v22 = vadd.f32 %v735_v0, %v3229_v8  ;;  %v832_v14 = vadd.f32 %v831_v12, %v3229_v8  ;;  %v737_v15 = vpop.f32.mrb[23].mxu0  ;;  %v833_v16 = vpop.f32.mrb[23].mxu1 }
 0x1cc   : > { %v738_v23 = vadd.f32 %v737_v15, %v3232_v11  ;;  %v834_v29 = vadd.f32 %v833_v16, %v3232_v11 }
 0x1cd   : > { %1385 = vst [vmem:[%s3239_s1 + $0x58] sm:$0xff] %v736_v22  ;;  %1401 = vst [vmem:[%s3239_s1 + $0xd8] sm:$0xff] %v832_v14 }
 0x1ce   : > { %1923 = vst [vmem:[%s3239_s1 + $0x158] sm:$0xff] %v738_v23  ;;  %1939 = vst [vmem:[%s3239_s1 + $0x1d8] sm:$0xff] %v834_v29  ;;  %v741_v6 = vpop.f32.mrb[24].mxu0  ;;  %v837_v32 = vpop.f32.mrb[24].mxu1 }
 0x1cf   : > { %v742_v37 = vadd.f32 %v741_v6, %v3229_v8  ;;  %v838_v38 = vadd.f32 %v837_v32, %v3229_v8  ;;  %v743_v39 = vpop.f32.mrb[25].mxu0  ;;  %v839_v41 = vpop.f32.mrb[25].mxu1 }
 0x1d0   : > { %v744_v49 = vadd.f32 %v743_v39, %v3232_v11  ;;  %v840_v50 = vadd.f32 %v839_v41, %v3232_v11 }
 0x1d1   : > { %1386 = vst [vmem:[%s3239_s1 + $0x60] sm:$0xff] %v742_v37  ;;  %1402 = vst [vmem:[%s3239_s1 + $0xe0] sm:$0xff] %v838_v38 }
 0x1d2   : > { %1924 = vst [vmem:[%s3239_s1 + $0x160] sm:$0xff] %v744_v49  ;;  %1940 = vst [vmem:[%s3239_s1 + $0x1e0] sm:$0xff] %v840_v50  ;;  %v747_v57 = vpop.f32.mrb[26].mxu0  ;;  %v843_v58 = vpop.f32.mrb[26].mxu1 }
 0x1d3   : > { %v748_v1 = vadd.f32 %v747_v57, %v3229_v8  ;;  %v844_v2 = vadd.f32 %v843_v58, %v3229_v8  ;;  %v749_v9 = vpop.f32.mrb[27].mxu0  ;;  %v845_v10 = vpop.f32.mrb[27].mxu1 }
 0x1d4   : > { %v750_v17 = vadd.f32 %v749_v9, %v3232_v11  ;;  %v846_v18 = vadd.f32 %v845_v10, %v3232_v11 }
 0x1d5   : > { %1387 = vst [vmem:[%s3239_s1 + $0x68] sm:$0xff] %v748_v1  ;;  %1403 = vst [vmem:[%s3239_s1 + $0xe8] sm:$0xff] %v844_v2 }
 0x1d6   : > { %1925 = vst [vmem:[%s3239_s1 + $0x168] sm:$0xff] %v750_v17  ;;  %1941 = vst [vmem:[%s3239_s1 + $0x1e8] sm:$0xff] %v846_v18  ;;  %v753_v25 = vpop.f32.mrb[28].mxu0  ;;  %v849_v26 = vpop.f32.mrb[28].mxu1 }
 0x1d7   : > { %v754_v33 = vadd.f32 %v753_v25, %v3229_v8  ;;  %v850_v34 = vadd.f32 %v849_v26, %v3229_v8  ;;  %v755_v42 = vpop.f32.mrb[29].mxu0  ;;  %v851_v43 = vpop.f32.mrb[29].mxu1 }
 0x1d8   : > { %v756_v20 = vadd.f32 %v755_v42, %v3232_v11  ;;  %v852_v21 = vadd.f32 %v851_v43, %v3232_v11 }
 0x1d9   : > { %1388 = vst [vmem:[%s3239_s1 + $0x70] sm:$0xff] %v754_v33  ;;  %1404 = vst [vmem:[%s3239_s1 + $0xf0] sm:$0xff] %v850_v34 }
 0x1da   : > { %1926 = vst [vmem:[%s3239_s1 + $0x170] sm:$0xff] %v756_v20  ;;  %1942 = vst [vmem:[%s3239_s1 + $0x1f0] sm:$0xff] %v852_v21  ;;  %v759_v40 = vpop.f32.mrb[30].mxu0  ;;  %v855_v44 = vpop.f32.mrb[30].mxu1 }
 0x1db   : > { %v760_v55 = vadd.f32 %v759_v40, %v3229_v8  ;;  %v856_v56 = vadd.f32 %v855_v44, %v3229_v8  ;;  %v761_v5 = vpop.f32.mrb[31].mxu0  ;;  %v857_v19 = vpop.f32.mrb[31].mxu1 }
 0x1dc   : > { %v762_v48 = vadd.f32 %v761_v5, %v3232_v11  ;;  %v858_v4 = vadd.f32 %v857_v19, %v3232_v11 }
 0x1dd   : > { %1389 = vst [vmem:[%s3239_s1 + $0x78] sm:$0xff] %v760_v55  ;;  %1405 = vst [vmem:[%s3239_s1 + $0xf8] sm:$0xff] %v856_v56 }
 0x1de   : > { %1927 = vst [vmem:[%s3239_s1 + $0x178] sm:$0xff] %v762_v48  ;;  %1943 = vst [vmem:[%s3239_s1 + $0x1f8] sm:$0xff] %v858_v4  ;;  %v926_v8 = vpop.f32.mrb[32].mxu1  ;;  %v1183_v3 = vpop.f32.mrb[32].mxu0 }
 0x1df   : > { %v927_v28 = vadd.f32 %v926_v8, %v3364_v35  ;;  %v1184_v47 = vadd.f32 %v1183_v3, %v3367_v52  ;;  %v928_v11 = vpop.f32.mrb[33].mxu1  ;;  %v1185_v54 = vpop.f32.mrb[33].mxu0 }
 0x1e0   : > { %v929_v13 = vadd.f32 %v928_v11, %v3372_v24  ;;  %v1186_v7 = vadd.f32 %v1185_v54, %v3375_v45 }
 0x1e1   : > { %1406 = vst [vmem:[%s3387_s28] sm:$0xff] %v927_v28  ;;  %1438 = vst [vmem:[%s3391_s30] sm:$0xff] %v1184_v47 }
 0x1e2   : > { %1944 = vst [vmem:[%s3387_s28 + $0x100] sm:$0xff] %v929_v13  ;;  %1976 = vst [vmem:[%s3391_s30 + $0x100] sm:$0xff] %v1186_v7  ;;  %v932_v62 = vpop.f32.mrb[34].mxu1  ;;  %v1189_v27 = vpop.f32.mrb[34].mxu0 }
 0x1e3   : > { %v933_v51 = vadd.f32 %v932_v62, %v3364_v35  ;;  %v1190_v46 = vadd.f32 %v1189_v27, %v3367_v52  ;;  %v934_v36 = vpop.f32.mrb[35].mxu1  ;;  %v1191_v59 = vpop.f32.mrb[35].mxu0 }
 0x1e4   : > { %v935_v60 = vadd.f32 %v934_v36, %v3372_v24  ;;  %v1192_v61 = vadd.f32 %v1191_v59, %v3375_v45 }
 0x1e5   : > { %1407 = vst [vmem:[%s3387_s28 + $0x8] sm:$0xff] %v933_v51  ;;  %1439 = vst [vmem:[%s3391_s30 + $0x8] sm:$0xff] %v1190_v46 }
 0x1e6   : > { %1945 = vst [vmem:[%s3387_s28 + $0x108] sm:$0xff] %v935_v60  ;;  %1977 = vst [vmem:[%s3391_s30 + $0x108] sm:$0xff] %v1192_v61  ;;  %v938_v0 = vpop.f32.mrb[36].mxu1  ;;  %v1195_v12 = vpop.f32.mrb[36].mxu0 }
 0x1e7   : > { %v939_v22 = vadd.f32 %v938_v0, %v3364_v35  ;;  %v1196_v14 = vadd.f32 %v1195_v12, %v3367_v52  ;;  %v940_v15 = vpop.f32.mrb[37].mxu1  ;;  %v1197_v16 = vpop.f32.mrb[37].mxu0 }
 0x1e8   : > { %v941_v23 = vadd.f32 %v940_v15, %v3372_v24  ;;  %v1198_v29 = vadd.f32 %v1197_v16, %v3375_v45 }
 0x1e9   : > { %1408 = vst [vmem:[%s3387_s28 + $0x10] sm:$0xff] %v939_v22  ;;  %1440 = vst [vmem:[%s3391_s30 + $0x10] sm:$0xff] %v1196_v14 }
 0x1ea   : > { %1946 = vst [vmem:[%s3387_s28 + $0x110] sm:$0xff] %v941_v23  ;;  %1978 = vst [vmem:[%s3391_s30 + $0x110] sm:$0xff] %v1198_v29  ;;  %v944_v6 = vpop.f32.mrb[38].mxu1  ;;  %v1201_v32 = vpop.f32.mrb[38].mxu0 }
 0x1eb   : > { %v945_v37 = vadd.f32 %v944_v6, %v3364_v35  ;;  %v1202_v38 = vadd.f32 %v1201_v32, %v3367_v52  ;;  %v946_v39 = vpop.f32.mrb[39].mxu1  ;;  %v1203_v41 = vpop.f32.mrb[39].mxu0 }
 0x1ec   : > { %v947_v49 = vadd.f32 %v946_v39, %v3372_v24  ;;  %v1204_v50 = vadd.f32 %v1203_v41, %v3375_v45 }
 0x1ed   : > { %1409 = vst [vmem:[%s3387_s28 + $0x18] sm:$0xff] %v945_v37  ;;  %1441 = vst [vmem:[%s3391_s30 + $0x18] sm:$0xff] %v1202_v38 }
 0x1ee   : > { %1947 = vst [vmem:[%s3387_s28 + $0x118] sm:$0xff] %v947_v49  ;;  %1979 = vst [vmem:[%s3391_s30 + $0x118] sm:$0xff] %v1204_v50  ;;  %v950_v57 = vpop.f32.mrb[40].mxu1  ;;  %v1207_v58 = vpop.f32.mrb[40].mxu0 }
 0x1ef   : > { %v951_v1 = vadd.f32 %v950_v57, %v3364_v35  ;;  %v1208_v2 = vadd.f32 %v1207_v58, %v3367_v52  ;;  %v952_v9 = vpop.f32.mrb[41].mxu1  ;;  %v1209_v10 = vpop.f32.mrb[41].mxu0 }
 0x1f0   : > { %v953_v17 = vadd.f32 %v952_v9, %v3372_v24  ;;  %v1210_v18 = vadd.f32 %v1209_v10, %v3375_v45 }
 0x1f1   : > { %1410 = vst [vmem:[%s3387_s28 + $0x20] sm:$0xff] %v951_v1  ;;  %1442 = vst [vmem:[%s3391_s30 + $0x20] sm:$0xff] %v1208_v2 }
 0x1f2   : > { %1948 = vst [vmem:[%s3387_s28 + $0x120] sm:$0xff] %v953_v17  ;;  %1980 = vst [vmem:[%s3391_s30 + $0x120] sm:$0xff] %v1210_v18  ;;  %v956_v25 = vpop.f32.mrb[42].mxu1  ;;  %v1213_v26 = vpop.f32.mrb[42].mxu0 }
 0x1f3   : > { %v957_v33 = vadd.f32 %v956_v25, %v3364_v35  ;;  %v1214_v34 = vadd.f32 %v1213_v26, %v3367_v52  ;;  %v958_v42 = vpop.f32.mrb[43].mxu1  ;;  %v1215_v43 = vpop.f32.mrb[43].mxu0 }
 0x1f4   : > { %v959_v53 = vadd.f32 %v958_v42, %v3372_v24  ;;  %v1216_v63 = vadd.f32 %v1215_v43, %v3375_v45 }
 0x1f5   : > { %1411 = vst [vmem:[%s3387_s28 + $0x28] sm:$0xff] %v957_v33  ;;  %1443 = vst [vmem:[%s3391_s30 + $0x28] sm:$0xff] %v1214_v34 }
 0x1f6   : > { %1949 = vst [vmem:[%s3387_s28 + $0x128] sm:$0xff] %v959_v53  ;;  %1981 = vst [vmem:[%s3391_s30 + $0x128] sm:$0xff] %v1216_v63  ;;  %v962_v20 = vpop.f32.mrb[44].mxu1  ;;  %v1219_v21 = vpop.f32.mrb[44].mxu0 }
 0x1f7   : > { %v963_v30 = vadd.f32 %v962_v20, %v3364_v35  ;;  %v1220_v31 = vadd.f32 %v1219_v21, %v3367_v52  ;;  %v964_v40 = vpop.f32.mrb[45].mxu1  ;;  %v1221_v44 = vpop.f32.mrb[45].mxu0 }
 0x1f8   : > { %v965_v55 = vadd.f32 %v964_v40, %v3372_v24  ;;  %v1222_v56 = vadd.f32 %v1221_v44, %v3375_v45 }
 0x1f9   : > { %1412 = vst [vmem:[%s3387_s28 + $0x30] sm:$0xff] %v963_v30  ;;  %1444 = vst [vmem:[%s3391_s30 + $0x30] sm:$0xff] %v1220_v31 }
 0x1fa   : > { %1950 = vst [vmem:[%s3387_s28 + $0x130] sm:$0xff] %v965_v55  ;;  %1982 = vst [vmem:[%s3391_s30 + $0x130] sm:$0xff] %v1222_v56  ;;  %v968_v5 = vpop.f32.mrb[46].mxu1  ;;  %v1225_v19 = vpop.f32.mrb[46].mxu0 }
 0x1fb   : > { %v969_v48 = vadd.f32 %v968_v5, %v3364_v35  ;;  %v1226_v4 = vadd.f32 %v1225_v19, %v3367_v52  ;;  %v970_v8 = vpop.f32.mrb[47].mxu1  ;;  %v1227_v3 = vpop.f32.mrb[47].mxu0 }
 0x1fc   : > { %v971_v28 = vadd.f32 %v970_v8, %v3372_v24  ;;  %v1228_v47 = vadd.f32 %v1227_v3, %v3375_v45 }
 0x1fd   : > { %1413 = vst [vmem:[%s3387_s28 + $0x38] sm:$0xff] %v969_v48  ;;  %1445 = vst [vmem:[%s3391_s30 + $0x38] sm:$0xff] %v1226_v4 }
 0x1fe   : > { %1951 = vst [vmem:[%s3387_s28 + $0x138] sm:$0xff] %v971_v28  ;;  %1983 = vst [vmem:[%s3391_s30 + $0x138] sm:$0xff] %v1228_v47  ;;  %v974_v11 = vpop.f32.mrb[48].mxu1  ;;  %v1231_v54 = vpop.f32.mrb[48].mxu0 }
 0x1ff   : > { %v975_v13 = vadd.f32 %v974_v11, %v3364_v35  ;;  %v1232_v7 = vadd.f32 %v1231_v54, %v3367_v52  ;;  %v976_v62 = vpop.f32.mrb[49].mxu1  ;;  %v1233_v27 = vpop.f32.mrb[49].mxu0 }
 0x200   : > { %v977_v51 = vadd.f32 %v976_v62, %v3372_v24  ;;  %v1234_v46 = vadd.f32 %v1233_v27, %v3375_v45 }
 0x201   : > { %1414 = vst [vmem:[%s3387_s28 + $0x40] sm:$0xff] %v975_v13  ;;  %1446 = vst [vmem:[%s3391_s30 + $0x40] sm:$0xff] %v1232_v7 }
 0x202   : > { %1952 = vst [vmem:[%s3387_s28 + $0x140] sm:$0xff] %v977_v51  ;;  %1984 = vst [vmem:[%s3391_s30 + $0x140] sm:$0xff] %v1234_v46  ;;  %v980_v36 = vpop.f32.mrb[50].mxu1  ;;  %v1237_v59 = vpop.f32.mrb[50].mxu0 }
 0x203   : > { %v981_v60 = vadd.f32 %v980_v36, %v3364_v35  ;;  %v1238_v61 = vadd.f32 %v1237_v59, %v3367_v52  ;;  %v982_v0 = vpop.f32.mrb[51].mxu1  ;;  %v1239_v12 = vpop.f32.mrb[51].mxu0 }
 0x204   : > { %v983_v22 = vadd.f32 %v982_v0, %v3372_v24  ;;  %v1240_v14 = vadd.f32 %v1239_v12, %v3375_v45 }
 0x205   : > { %1415 = vst [vmem:[%s3387_s28 + $0x48] sm:$0xff] %v981_v60  ;;  %1447 = vst [vmem:[%s3391_s30 + $0x48] sm:$0xff] %v1238_v61 }
 0x206   : > { %1953 = vst [vmem:[%s3387_s28 + $0x148] sm:$0xff] %v983_v22  ;;  %1985 = vst [vmem:[%s3391_s30 + $0x148] sm:$0xff] %v1240_v14  ;;  %v986_v15 = vpop.f32.mrb[52].mxu1  ;;  %v1243_v16 = vpop.f32.mrb[52].mxu0 }
 0x207   : > { %v987_v23 = vadd.f32 %v986_v15, %v3364_v35  ;;  %v1244_v29 = vadd.f32 %v1243_v16, %v3367_v52  ;;  %v988_v6 = vpop.f32.mrb[53].mxu1  ;;  %v1245_v32 = vpop.f32.mrb[53].mxu0 }
 0x208   : > { %v989_v37 = vadd.f32 %v988_v6, %v3372_v24  ;;  %v1246_v38 = vadd.f32 %v1245_v32, %v3375_v45 }
 0x209   : > { %1416 = vst [vmem:[%s3387_s28 + $0x50] sm:$0xff] %v987_v23  ;;  %1448 = vst [vmem:[%s3391_s30 + $0x50] sm:$0xff] %v1244_v29 }
 0x20a   : > { %1954 = vst [vmem:[%s3387_s28 + $0x150] sm:$0xff] %v989_v37  ;;  %1986 = vst [vmem:[%s3391_s30 + $0x150] sm:$0xff] %v1246_v38  ;;  %v992_v39 = vpop.f32.mrb[54].mxu1  ;;  %v1249_v41 = vpop.f32.mrb[54].mxu0 }
 0x20b   : > { %v993_v49 = vadd.f32 %v992_v39, %v3364_v35  ;;  %v1250_v50 = vadd.f32 %v1249_v41, %v3367_v52  ;;  %v994_v57 = vpop.f32.mrb[55].mxu1  ;;  %v1251_v58 = vpop.f32.mrb[55].mxu0 }
 0x20c   : > { %v995_v1 = vadd.f32 %v994_v57, %v3372_v24  ;;  %v1252_v2 = vadd.f32 %v1251_v58, %v3375_v45 }
 0x20d   : > { %1417 = vst [vmem:[%s3387_s28 + $0x58] sm:$0xff] %v993_v49  ;;  %1449 = vst [vmem:[%s3391_s30 + $0x58] sm:$0xff] %v1250_v50 }
 0x20e   : > { %1955 = vst [vmem:[%s3387_s28 + $0x158] sm:$0xff] %v995_v1  ;;  %1987 = vst [vmem:[%s3391_s30 + $0x158] sm:$0xff] %v1252_v2  ;;  %v998_v9 = vpop.f32.mrb[56].mxu1  ;;  %v1255_v10 = vpop.f32.mrb[56].mxu0 }
 0x20f   : > { %v999_v17 = vadd.f32 %v998_v9, %v3364_v35  ;;  %v1256_v18 = vadd.f32 %v1255_v10, %v3367_v52  ;;  %v1000_v25 = vpop.f32.mrb[57].mxu1  ;;  %v1257_v26 = vpop.f32.mrb[57].mxu0 }
 0x210   : > { %v1001_v33 = vadd.f32 %v1000_v25, %v3372_v24  ;;  %v1258_v34 = vadd.f32 %v1257_v26, %v3375_v45 }
 0x211   : > { %1418 = vst [vmem:[%s3387_s28 + $0x60] sm:$0xff] %v999_v17  ;;  %1450 = vst [vmem:[%s3391_s30 + $0x60] sm:$0xff] %v1256_v18 }
 0x212   : > { %1956 = vst [vmem:[%s3387_s28 + $0x160] sm:$0xff] %v1001_v33  ;;  %1988 = vst [vmem:[%s3391_s30 + $0x160] sm:$0xff] %v1258_v34  ;;  %v1004_v42 = vpop.f32.mrb[58].mxu1  ;;  %v1261_v43 = vpop.f32.mrb[58].mxu0 }
 0x213   : > { %v1005_v53 = vadd.f32 %v1004_v42, %v3364_v35  ;;  %v1262_v63 = vadd.f32 %v1261_v43, %v3367_v52  ;;  %v1006_v20 = vpop.f32.mrb[59].mxu1  ;;  %v1263_v21 = vpop.f32.mrb[59].mxu0 }
 0x214   : > { %v1007_v30 = vadd.f32 %v1006_v20, %v3372_v24  ;;  %v1264_v31 = vadd.f32 %v1263_v21, %v3375_v45 }
 0x215   : > { %1419 = vst [vmem:[%s3387_s28 + $0x68] sm:$0xff] %v1005_v53  ;;  %1451 = vst [vmem:[%s3391_s30 + $0x68] sm:$0xff] %v1262_v63 }
 0x216   : > { %1957 = vst [vmem:[%s3387_s28 + $0x168] sm:$0xff] %v1007_v30  ;;  %1989 = vst [vmem:[%s3391_s30 + $0x168] sm:$0xff] %v1264_v31  ;;  %v1010_v40 = vpop.f32.mrb[60].mxu1  ;;  %v1267_v44 = vpop.f32.mrb[60].mxu0 }
 0x217   : > { %v1011_v55 = vadd.f32 %v1010_v40, %v3364_v35  ;;  %v1268_v56 = vadd.f32 %v1267_v44, %v3367_v52  ;;  %v1012_v5 = vpop.f32.mrb[61].mxu1  ;;  %v1269_v19 = vpop.f32.mrb[61].mxu0 }
 0x218   : > { %v1013_v48 = vadd.f32 %v1012_v5, %v3372_v24  ;;  %v1270_v4 = vadd.f32 %v1269_v19, %v3375_v45 }
 0x219   : > { %1420 = vst [vmem:[%s3387_s28 + $0x70] sm:$0xff] %v1011_v55  ;;  %1452 = vst [vmem:[%s3391_s30 + $0x70] sm:$0xff] %v1268_v56 }
 0x21a   : > { %1958 = vst [vmem:[%s3387_s28 + $0x170] sm:$0xff] %v1013_v48  ;;  %1990 = vst [vmem:[%s3391_s30 + $0x170] sm:$0xff] %v1270_v4  ;;  %v1016_v8 = vpop.f32.mrb[62].mxu1  ;;  %v1273_v3 = vpop.f32.mrb[62].mxu0 }
 0x21b   : > { %v1017_v28 = vadd.f32 %v1016_v8, %v3364_v35  ;;  %v1274_v47 = vadd.f32 %v1273_v3, %v3367_v52  ;;  %v1018_v11 = vpop.f32.mrb[63].mxu1  ;;  %v1275_v54 = vpop.f32.mrb[63].mxu0 }
 0x21c   : > { %v1019_v13 = vadd.f32 %v1018_v11, %v3372_v24  ;;  %v1276_v7 = vadd.f32 %v1275_v54, %v3375_v45 }
 0x21d   : > { %1421 = vst [vmem:[%s3387_s28 + $0x78] sm:$0xff] %v1017_v28  ;;  %1453 = vst [vmem:[%s3391_s30 + $0x78] sm:$0xff] %v1274_v47 }
 0x21e   : > { %1959 = vst [vmem:[%s3387_s28 + $0x178] sm:$0xff] %v1019_v13  ;;  %1991 = vst [vmem:[%s3391_s30 + $0x178] sm:$0xff] %v1276_v7  ;;  %v1022_v62 = vpop.f32.mrb[64].mxu1  ;;  %v1279_v27 = vpop.f32.mrb[64].mxu0 }
 0x21f   : > { %v1023_v51 = vadd.f32 %v1022_v62, %v3364_v35  ;;  %v1280_v46 = vadd.f32 %v1279_v27, %v3367_v52  ;;  %v1024_v36 = vpop.f32.mrb[65].mxu1  ;;  %v1281_v59 = vpop.f32.mrb[65].mxu0 }
 0x220   : > { %v1025_v60 = vadd.f32 %v1024_v36, %v3372_v24  ;;  %v1282_v61 = vadd.f32 %v1281_v59, %v3375_v45 }
 0x221   : > { %1422 = vst [vmem:[%s3387_s28 + $0x80] sm:$0xff] %v1023_v51  ;;  %1454 = vst [vmem:[%s3391_s30 + $0x80] sm:$0xff] %v1280_v46 }
 0x222   : > { %1960 = vst [vmem:[%s3387_s28 + $0x180] sm:$0xff] %v1025_v60  ;;  %1992 = vst [vmem:[%s3391_s30 + $0x180] sm:$0xff] %v1282_v61  ;;  %v1028_v0 = vpop.f32.mrb[66].mxu1  ;;  %v1285_v12 = vpop.f32.mrb[66].mxu0 }
 0x223   : > { %v1029_v22 = vadd.f32 %v1028_v0, %v3364_v35  ;;  %v1286_v14 = vadd.f32 %v1285_v12, %v3367_v52  ;;  %v1030_v15 = vpop.f32.mrb[67].mxu1  ;;  %v1287_v16 = vpop.f32.mrb[67].mxu0 }
 0x224   : > { %v1031_v23 = vadd.f32 %v1030_v15, %v3372_v24  ;;  %v1288_v29 = vadd.f32 %v1287_v16, %v3375_v45 }
 0x225   : > { %1423 = vst [vmem:[%s3387_s28 + $0x88] sm:$0xff] %v1029_v22  ;;  %1455 = vst [vmem:[%s3391_s30 + $0x88] sm:$0xff] %v1286_v14 }
 0x226   : > { %1961 = vst [vmem:[%s3387_s28 + $0x188] sm:$0xff] %v1031_v23  ;;  %1993 = vst [vmem:[%s3391_s30 + $0x188] sm:$0xff] %v1288_v29  ;;  %v1034_v6 = vpop.f32.mrb[68].mxu1  ;;  %v1291_v32 = vpop.f32.mrb[68].mxu0 }
 0x227   : > { %v1035_v37 = vadd.f32 %v1034_v6, %v3364_v35  ;;  %v1292_v38 = vadd.f32 %v1291_v32, %v3367_v52  ;;  %v1036_v39 = vpop.f32.mrb[69].mxu1  ;;  %v1293_v41 = vpop.f32.mrb[69].mxu0 }
 0x228   : > { %v1037_v49 = vadd.f32 %v1036_v39, %v3372_v24  ;;  %v1294_v50 = vadd.f32 %v1293_v41, %v3375_v45 }
 0x229   : > { %1424 = vst [vmem:[%s3387_s28 + $0x90] sm:$0xff] %v1035_v37  ;;  %1456 = vst [vmem:[%s3391_s30 + $0x90] sm:$0xff] %v1292_v38 }
 0x22a   : > { %1962 = vst [vmem:[%s3387_s28 + $0x190] sm:$0xff] %v1037_v49  ;;  %1994 = vst [vmem:[%s3391_s30 + $0x190] sm:$0xff] %v1294_v50  ;;  %v1040_v57 = vpop.f32.mrb[70].mxu1  ;;  %v1297_v58 = vpop.f32.mrb[70].mxu0 }
 0x22b   : > { %v1041_v1 = vadd.f32 %v1040_v57, %v3364_v35  ;;  %v1298_v2 = vadd.f32 %v1297_v58, %v3367_v52  ;;  %v1042_v9 = vpop.f32.mrb[71].mxu1  ;;  %v1299_v10 = vpop.f32.mrb[71].mxu0 }
 0x22c   : > { %v1043_v17 = vadd.f32 %v1042_v9, %v3372_v24  ;;  %v1300_v18 = vadd.f32 %v1299_v10, %v3375_v45 }
 0x22d   : > { %1425 = vst [vmem:[%s3387_s28 + $0x98] sm:$0xff] %v1041_v1  ;;  %1457 = vst [vmem:[%s3391_s30 + $0x98] sm:$0xff] %v1298_v2 }
 0x22e   : > { %1963 = vst [vmem:[%s3387_s28 + $0x198] sm:$0xff] %v1043_v17  ;;  %1995 = vst [vmem:[%s3391_s30 + $0x198] sm:$0xff] %v1300_v18  ;;  %v1046_v25 = vpop.f32.mrb[72].mxu1  ;;  %v1303_v26 = vpop.f32.mrb[72].mxu0 }
 0x22f   : > { %v1047_v33 = vadd.f32 %v1046_v25, %v3364_v35  ;;  %v1304_v34 = vadd.f32 %v1303_v26, %v3367_v52  ;;  %v1048_v42 = vpop.f32.mrb[73].mxu1  ;;  %v1305_v43 = vpop.f32.mrb[73].mxu0 }
 0x230   : > { %v1049_v53 = vadd.f32 %v1048_v42, %v3372_v24  ;;  %v1306_v63 = vadd.f32 %v1305_v43, %v3375_v45 }
 0x231   : > { %1426 = vst [vmem:[%s3387_s28 + $0xa0] sm:$0xff] %v1047_v33  ;;  %1458 = vst [vmem:[%s3391_s30 + $0xa0] sm:$0xff] %v1304_v34 }
 0x232   : > { %1964 = vst [vmem:[%s3387_s28 + $0x1a0] sm:$0xff] %v1049_v53  ;;  %1996 = vst [vmem:[%s3391_s30 + $0x1a0] sm:$0xff] %v1306_v63  ;;  %v1052_v20 = vpop.f32.mrb[74].mxu1  ;;  %v1309_v21 = vpop.f32.mrb[74].mxu0 }
 0x233   : > { %v1053_v30 = vadd.f32 %v1052_v20, %v3364_v35  ;;  %v1310_v31 = vadd.f32 %v1309_v21, %v3367_v52  ;;  %v1054_v40 = vpop.f32.mrb[75].mxu1  ;;  %v1311_v44 = vpop.f32.mrb[75].mxu0 }
 0x234   : > { %v1055_v55 = vadd.f32 %v1054_v40, %v3372_v24  ;;  %v1312_v56 = vadd.f32 %v1311_v44, %v3375_v45 }
 0x235   : > { %1427 = vst [vmem:[%s3387_s28 + $0xa8] sm:$0xff] %v1053_v30  ;;  %1459 = vst [vmem:[%s3391_s30 + $0xa8] sm:$0xff] %v1310_v31 }
 0x236   : > { %1965 = vst [vmem:[%s3387_s28 + $0x1a8] sm:$0xff] %v1055_v55  ;;  %1997 = vst [vmem:[%s3391_s30 + $0x1a8] sm:$0xff] %v1312_v56  ;;  %v1058_v5 = vpop.f32.mrb[76].mxu1  ;;  %v1315_v19 = vpop.f32.mrb[76].mxu0 }
 0x237   : > { %v1059_v48 = vadd.f32 %v1058_v5, %v3364_v35  ;;  %v1316_v4 = vadd.f32 %v1315_v19, %v3367_v52  ;;  %v1060_v8 = vpop.f32.mrb[77].mxu1  ;;  %v1317_v3 = vpop.f32.mrb[77].mxu0 }
 0x238   : > { %v1061_v28 = vadd.f32 %v1060_v8, %v3372_v24  ;;  %v1318_v47 = vadd.f32 %v1317_v3, %v3375_v45 }
 0x239   : > { %1428 = vst [vmem:[%s3387_s28 + $0xb0] sm:$0xff] %v1059_v48  ;;  %1460 = vst [vmem:[%s3391_s30 + $0xb0] sm:$0xff] %v1316_v4 }
 0x23a   : > { %1966 = vst [vmem:[%s3387_s28 + $0x1b0] sm:$0xff] %v1061_v28  ;;  %1998 = vst [vmem:[%s3391_s30 + $0x1b0] sm:$0xff] %v1318_v47  ;;  %v1064_v11 = vpop.f32.mrb[78].mxu1  ;;  %v1321_v54 = vpop.f32.mrb[78].mxu0 }
 0x23b   : > { %v1065_v13 = vadd.f32 %v1064_v11, %v3364_v35  ;;  %v1322_v7 = vadd.f32 %v1321_v54, %v3367_v52  ;;  %v1066_v62 = vpop.f32.mrb[79].mxu1  ;;  %v1323_v27 = vpop.f32.mrb[79].mxu0 }
 0x23c   : > { %v1067_v51 = vadd.f32 %v1066_v62, %v3372_v24  ;;  %v1324_v46 = vadd.f32 %v1323_v27, %v3375_v45 }
 0x23d   : > { %1429 = vst [vmem:[%s3387_s28 + $0xb8] sm:$0xff] %v1065_v13  ;;  %1461 = vst [vmem:[%s3391_s30 + $0xb8] sm:$0xff] %v1322_v7 }
 0x23e   : > { %1967 = vst [vmem:[%s3387_s28 + $0x1b8] sm:$0xff] %v1067_v51  ;;  %1999 = vst [vmem:[%s3391_s30 + $0x1b8] sm:$0xff] %v1324_v46  ;;  %v1070_v36 = vpop.f32.mrb[80].mxu1  ;;  %v1327_v59 = vpop.f32.mrb[80].mxu0 }
 0x23f   : > { %v1071_v60 = vadd.f32 %v1070_v36, %v3364_v35  ;;  %v1328_v61 = vadd.f32 %v1327_v59, %v3367_v52  ;;  %v1072_v0 = vpop.f32.mrb[81].mxu1  ;;  %v1329_v12 = vpop.f32.mrb[81].mxu0 }
 0x240   : > { %v1073_v22 = vadd.f32 %v1072_v0, %v3372_v24  ;;  %v1330_v14 = vadd.f32 %v1329_v12, %v3375_v45 }
 0x241   : > { %1430 = vst [vmem:[%s3387_s28 + $0xc0] sm:$0xff] %v1071_v60  ;;  %1462 = vst [vmem:[%s3391_s30 + $0xc0] sm:$0xff] %v1328_v61 }
 0x242   : > { %1968 = vst [vmem:[%s3387_s28 + $0x1c0] sm:$0xff] %v1073_v22  ;;  %2000 = vst [vmem:[%s3391_s30 + $0x1c0] sm:$0xff] %v1330_v14  ;;  %v1076_v15 = vpop.f32.mrb[82].mxu1  ;;  %v1333_v16 = vpop.f32.mrb[82].mxu0 }
 0x243   : > { %v1077_v23 = vadd.f32 %v1076_v15, %v3364_v35  ;;  %v1334_v29 = vadd.f32 %v1333_v16, %v3367_v52  ;;  %v1078_v6 = vpop.f32.mrb[83].mxu1  ;;  %v1335_v32 = vpop.f32.mrb[83].mxu0 }
 0x244   : > { %v1079_v37 = vadd.f32 %v1078_v6, %v3372_v24  ;;  %v1336_v38 = vadd.f32 %v1335_v32, %v3375_v45 }
 0x245   : > { %1431 = vst [vmem:[%s3387_s28 + $0xc8] sm:$0xff] %v1077_v23  ;;  %1463 = vst [vmem:[%s3391_s30 + $0xc8] sm:$0xff] %v1334_v29 }
 0x246   : > { %1969 = vst [vmem:[%s3387_s28 + $0x1c8] sm:$0xff] %v1079_v37  ;;  %2001 = vst [vmem:[%s3391_s30 + $0x1c8] sm:$0xff] %v1336_v38  ;;  %v1082_v39 = vpop.f32.mrb[84].mxu1  ;;  %v1339_v41 = vpop.f32.mrb[84].mxu0 }
 0x247   : > { %v1083_v49 = vadd.f32 %v1082_v39, %v3364_v35  ;;  %v1340_v50 = vadd.f32 %v1339_v41, %v3367_v52  ;;  %v1084_v57 = vpop.f32.mrb[85].mxu1  ;;  %v1341_v58 = vpop.f32.mrb[85].mxu0 }
 0x248   : > { %v1085_v1 = vadd.f32 %v1084_v57, %v3372_v24  ;;  %v1342_v2 = vadd.f32 %v1341_v58, %v3375_v45 }
 0x249   : > { %1432 = vst [vmem:[%s3387_s28 + $0xd0] sm:$0xff] %v1083_v49  ;;  %1464 = vst [vmem:[%s3391_s30 + $0xd0] sm:$0xff] %v1340_v50 }
 0x24a   : > { %1970 = vst [vmem:[%s3387_s28 + $0x1d0] sm:$0xff] %v1085_v1  ;;  %2002 = vst [vmem:[%s3391_s30 + $0x1d0] sm:$0xff] %v1342_v2  ;;  %v1088_v9 = vpop.f32.mrb[86].mxu1  ;;  %v1345_v10 = vpop.f32.mrb[86].mxu0 }
 0x24b   : > { %v1089_v17 = vadd.f32 %v1088_v9, %v3364_v35  ;;  %v1346_v18 = vadd.f32 %v1345_v10, %v3367_v52  ;;  %v1090_v25 = vpop.f32.mrb[87].mxu1  ;;  %v1347_v26 = vpop.f32.mrb[87].mxu0 }
 0x24c   : > { %v1091_v33 = vadd.f32 %v1090_v25, %v3372_v24  ;;  %v1348_v34 = vadd.f32 %v1347_v26, %v3375_v45 }
 0x24d   : > { %1433 = vst [vmem:[%s3387_s28 + $0xd8] sm:$0xff] %v1089_v17  ;;  %1465 = vst [vmem:[%s3391_s30 + $0xd8] sm:$0xff] %v1346_v18 }
 0x24e   : > { %1971 = vst [vmem:[%s3387_s28 + $0x1d8] sm:$0xff] %v1091_v33  ;;  %2003 = vst [vmem:[%s3391_s30 + $0x1d8] sm:$0xff] %v1348_v34  ;;  %v1094_v42 = vpop.f32.mrb[88].mxu1  ;;  %v1351_v43 = vpop.f32.mrb[88].mxu0 }
 0x24f   : > { %v1095_v53 = vadd.f32 %v1094_v42, %v3364_v35  ;;  %v1352_v63 = vadd.f32 %v1351_v43, %v3367_v52  ;;  %v1096_v20 = vpop.f32.mrb[89].mxu1  ;;  %v1353_v21 = vpop.f32.mrb[89].mxu0 }
 0x250   : > { %v1097_v30 = vadd.f32 %v1096_v20, %v3372_v24  ;;  %v1354_v31 = vadd.f32 %v1353_v21, %v3375_v45 }
 0x251   : > { %1434 = vst [vmem:[%s3387_s28 + $0xe0] sm:$0xff] %v1095_v53  ;;  %1466 = vst [vmem:[%s3391_s30 + $0xe0] sm:$0xff] %v1352_v63 }
 0x252   : > { %1972 = vst [vmem:[%s3387_s28 + $0x1e0] sm:$0xff] %v1097_v30  ;;  %2004 = vst [vmem:[%s3391_s30 + $0x1e0] sm:$0xff] %v1354_v31  ;;  %v1100_v40 = vpop.f32.mrb[90].mxu1  ;;  %v1357_v44 = vpop.f32.mrb[90].mxu0 }
 0x253   : > { %v1101_v55 = vadd.f32 %v1100_v40, %v3364_v35  ;;  %v1358_v56 = vadd.f32 %v1357_v44, %v3367_v52  ;;  %v1102_v5 = vpop.f32.mrb[91].mxu1  ;;  %v1359_v19 = vpop.f32.mrb[91].mxu0 }
 0x254   : > { %v1103_v48 = vadd.f32 %v1102_v5, %v3372_v24  ;;  %v1360_v4 = vadd.f32 %v1359_v19, %v3375_v45 }
 0x255   : > { %1435 = vst [vmem:[%s3387_s28 + $0xe8] sm:$0xff] %v1101_v55  ;;  %1467 = vst [vmem:[%s3391_s30 + $0xe8] sm:$0xff] %v1358_v56 }
 0x256   : > { %1973 = vst [vmem:[%s3387_s28 + $0x1e8] sm:$0xff] %v1103_v48  ;;  %2005 = vst [vmem:[%s3391_s30 + $0x1e8] sm:$0xff] %v1360_v4  ;;  %v1106_v8 = vpop.f32.mrb[92].mxu1  ;;  %v1363_v3 = vpop.f32.mrb[92].mxu0 }
 0x257   : > { %v1107_v28 = vadd.f32 %v1106_v8, %v3364_v35  ;;  %v1364_v47 = vadd.f32 %v1363_v3, %v3367_v52  ;;  %v1108_v11 = vpop.f32.mrb[93].mxu1  ;;  %v1365_v54 = vpop.f32.mrb[93].mxu0 }
 0x258   : > { %v1109_v13 = vadd.f32 %v1108_v11, %v3372_v24  ;;  %v1366_v7 = vadd.f32 %v1365_v54, %v3375_v45 }
 0x259   : > { %1436 = vst [vmem:[%s3387_s28 + $0xf0] sm:$0xff] %v1107_v28  ;;  %1468 = vst [vmem:[%s3391_s30 + $0xf0] sm:$0xff] %v1364_v47 }
 0x25a   : > { %1974 = vst [vmem:[%s3387_s28 + $0x1f0] sm:$0xff] %v1109_v13  ;;  %2006 = vst [vmem:[%s3391_s30 + $0x1f0] sm:$0xff] %v1366_v7  ;;  %v1112_v62 = vpop.f32.mrb[94].mxu1  ;;  %v1369_v27 = vpop.f32.mrb[94].mxu0 }
 0x25b   : > { %v1113_v51 = vadd.f32 %v1112_v62, %v3364_v35  ;;  %v1370_v46 = vadd.f32 %v1369_v27, %v3367_v52  ;;  %v1114_v36 = vpop.f32.mrb[95].mxu1  ;;  %v1371_v59 = vpop.f32.mrb[95].mxu0 }
 0x25c   : > { %v1115_v60 = vadd.f32 %v1114_v36, %v3372_v24  ;;  %v1372_v61 = vadd.f32 %v1371_v59, %v3375_v45 }
 0x25d   : > { %1437 = vst [vmem:[%s3387_s28 + $0xf8] sm:$0xff] %v1113_v51  ;;  %1469 = vst [vmem:[%s3391_s30 + $0xf8] sm:$0xff] %v1370_v46 }
 0x25e   : > { %1975 = vst [vmem:[%s3387_s28 + $0x1f8] sm:$0xff] %v1115_v60  ;;  %2007 = vst [vmem:[%s3391_s30 + $0x1f8] sm:$0xff] %v1372_v61 }
 0x25f   : > { %s2011_s13 = sshll.u32 %s2548_s21, 5  ;;  %s2012_s16 = sshll.u32 %s2552_s22, 7 }
 0x260   : > { %s1592_s14 = sadd.s32 %s2012_s16, %s2011_s13  ;;  %s1611_s17 = sshll.u32 %s3239_s1, 4  ;;  %s1612_s17 = int_to_ptr.vmem [resolvable:$true] %s1611_s17 }
 0x261   : > { %s3652_s6 = sshll.u32 %s1592_s14, 7  ;;  %s2573_s29 = smov 4096  }
 0x262   : > { %s1594_s27 = scalar_lea.hbm %s3745_s3, %s3652_s6  ;;  %2257 = sst [smem:[#allocation13]] (%p2764_p6), %s2573_s29 }
 0x263   : > { %s2574_s15 = smov 8192   ;;  %s2575_s21 = smov 32  }
 0x264   : > { %2258 = sst [smem:[#allocation13 + $0x1]] (%p2764_p6), %s2574_s15  ;;  %s2576_s22 = smov 128  }
 0x265   : > { %2259 = sst [smem:[#allocation13 + $0x2]] (%p2764_p6), %s2575_s21  ;;  %s2577_s5 = smov 8  }
 0x266   : > { %2260 = sst [smem:[#allocation13 + $0x3]] (%p2764_p6), %s2576_s22  ;;  %s2578_s18 = smov [#allocation12]  }
 0x267   : > { %2261 = sst [smem:[#allocation13 + $0x4]] (%p2764_p6), %s2576_s22  ;;  %s2579_s9 = smov 0  }
 0x268   : > { %2262 = sst [smem:[#allocation13 + $0x5]] (%p2764_p6), %s2577_s5 }
 0x269   : > { %2263 = dma.general (%p2764_p6), %s1612_s17, 8192, %s1594_s27, %s1570_s12, %s2578_s18, [#allocation13], %s2579_s9, 0  }
 0x26a   : > { %s3836_s13 = sld [smem:[#allocation42_spill]]  ;;  %s1658_s14 = sshll.u32 %s3387_s28, 4  ;;  %s1659_s14 = int_to_ptr.vmem [resolvable:$true] %s1658_s14 }
 0x26b   : > { %s2580_s26 = smov 4096   ;;  %s2581_s12 = smov 8192  }
 0x26c   : > { %2264 = sst [smem:[#allocation15]] (%p2764_p6), %s2580_s26  ;;  %s2582_s17 = smov 32  }
 0x26d   : > { %2265 = sst [smem:[#allocation15 + $0x1]] (%p2764_p6), %s2581_s12  ;;  %s2583_s7 = smov 128  }
 0x26e   : > { %2266 = sst [smem:[#allocation15 + $0x2]] (%p2764_p6), %s2582_s17  ;;  %s2584_s27 = smov 8  }
 0x26f   : > { %2267 = sst [smem:[#allocation15 + $0x3]] (%p2764_p6), %s2583_s7  ;;  %s2585_s29 = smov [#allocation14]  }
 0x270   : > { %s1641_s16 = scalar_lea.hbm %s3836_s13, %s3652_s6  ;;  %2268 = sst [smem:[#allocation15 + $0x4]] (%p2764_p6), %s2583_s7 }
 0x271   : > { %2269 = sst [smem:[#allocation15 + $0x5]] (%p2764_p6), %s2584_s27  ;;  %s2586_s28 = smov 0  }
 0x272   : > { %2270 = dma.general (%p2764_p6), %s1659_s14, 8192, %s1641_s16, %s3647_s8, %s2585_s29, [#allocation15], %s2586_s28, 0  }
 0x273   : > { %s3837_s22 = sld [smem:[#allocation43_spill]]  ;;  %s1705_s18 = sshll.u32 %s3391_s30, 4  ;;  %s1706_s18 = int_to_ptr.vmem [resolvable:$true] %s1705_s18 }
 0x274   : > { %s2587_s9 = smov 4096   ;;  %s2588_s1 = smov 8192  }
 0x275   : > { %2271 = sst [smem:[#allocation17]] (%p2764_p6), %s2587_s9  ;;  %s2589_s4 = smov 32  }
 0x276   : > { %2272 = sst [smem:[#allocation17 + $0x1]] (%p2764_p6), %s2588_s1  ;;  %s2590_s13 = smov 128  }
 0x277   : > { %2273 = sst [smem:[#allocation17 + $0x2]] (%p2764_p6), %s2589_s4  ;;  %s2591_s16 = smov 8  }
 0x278   : > { %2274 = sst [smem:[#allocation17 + $0x3]] (%p2764_p6), %s2590_s13  ;;  %s2593_s30 = smov 0  }
 0x279   : > { %s1688_s5 = scalar_lea.hbm %s3837_s22, %s3652_s6  ;;  %2275 = sst [smem:[#allocation17 + $0x4]] (%p2764_p6), %s2590_s13 }
 0x27a   : > { %2276 = sst [smem:[#allocation17 + $0x5]] (%p2764_p6), %s2591_s16  ;;  %s2592_s6 = smov [#allocation16]  }
 0x27b   : > { %2277 = dma.general (%p2764_p6), %s1706_s18, 8192, %s1688_s5, %s3647_s8, %s2592_s6, [#allocation17], %s2593_s30, 0  }
 0x27c PF: > { %s3838_s14 = sld [smem:[#allocation22_spill]]  ;;  %s3839_s26 = sld [smem:[#allocation23_spill]] }
 0x27d   : > { %p2307_p10 = scmp.ge.s32.totalorder %s2564_s25, 2 }
 0x282   : > { %s1733_s12 = sand.u32 1, %s3838_s14   ;;  %p3840_p4 = scmp.ne.s32.totalorder %s3839_s26, 0 }
 0x283   : > { %s1734_s17 = scalar_lea.sflag [#allocation4], %s1733_s12 }
 0x284   : > { %p2293_p8 = pnand %p2307_p10, %p3840_p4 }
 0x286   : > { %2527 = dma.done.wait (!%p2293_p8), %s1734_s17, 8192  }
 0x287   : > { %2529 = vsyncadd (!%p2293_p8), %s1734_s17, 4294959104  ;;  %s3841_s7 = sadd.s32 4294967294, %s2564_s25  }
 0x288   : > { %s1742_s27 = sand.u32 1, %s3841_s7  }
 0x289   : > { %s1743_s29 = scalar_lea.sflag [#allocation10], %s1742_s27 }
 0x28a   : > { %2531 = dma.done.wait (!%p2293_p8), %s1743_s29, 16384  }
 0x28b   : > { %2533 = vsyncadd (!%p2293_p8), %s1743_s29, 4294950912  ;;  %s26_s25 = sadd.s32 1, %s2564_s25   ;;  %s3842_s10 = sld [smem:[#allocation24_spill]] }
 0x28c   : > { %p23_p6 = scmp.ge.s32.totalorder %s26_s25, 6   ;;  %s3843_s18 = smov %s2540_s19 }
 0x28d   : > { %s3844_s19 = smov %s2544_s20  ;;  %s3845_s20 = smov %s2777_s2 }
 0x28e   : > { %s3846_s21 = smov %s2556_s23  ;;  %s3847_s22 = smov %s2560_s24 }
 0x28f   : > { %s3849_s24 = smov %s3855_s11  ;;  %25 = sbr.rel (!%p23_p6) target bundleno = 15 (0xf), region = 135 }
 0x291   : > { %s3848_s23 = smov %s3842_s10 }
 0x296   :  { %1757 = vsyncpa [#allocation3], 1 }
 0x297   :  { %1759 = vsyncpa [#allocation3 + $0x1], 1 }
 0x298   :  { %1760 = vsyncpa [#allocation6], 1 }
 0x299   :  { %1761 = vsyncpa [#allocation4], 1 }
 0x29a   :  { %1763 = vsyncpa [#allocation4 + $0x1], 1 }
 0x29b   :  { %1764 = vsyncpa [#allocation10], 1 }
 0x29c   :  { %1766 = vsyncpa [#allocation10 + $0x1], 1 }

</bundles_post_ra>
